<compile_context>
chip_gen: v7x
topology: tpu7x:2x2x1
jax: 0.10.0
libtpu: 0.0.40
codegen_flags: <defaults>
</compile_context>

<pallas_src>
import math

import jax
import jax.numpy as jnp
from jax.experimental import pallas as pl
from jax.experimental.pallas import tpu as pltpu

# ----------------------------- config (small, synthetic "bert") -------------
BATCH = 2
SEQ = 8
HIDDEN = 32
N_HEADS = 2
HEAD_DIM = HIDDEN // N_HEADS
INTER = 64
N_LAYERS = 2
VOCAB = 100
NUM_OUTPUT = 3
LN_EPS = 1e-12
OUT_PAD = 128  # lane-dense classifier output slab (sliced to NUM_OUTPUT outside)


# ----------------------------- fused Pallas kernel ---------------------------
def _fused_bert_kernel(
    x_ref, mask_ref, emb_g_ref, emb_b_ref,
    wqkv_ref, bqkv_ref, wo_ref, bo_ref, ln1_g_ref, ln1_b_ref,
    wi_ref, bi_ref, wo2_ref, bo2_ref, ln2_g_ref, ln2_b_ref,
    pool_w_ref, pool_b_ref, cls_w_ref, cls_b_ref,
    o_ref,
    ctx_ref, cls_ref,
):
    B, S = mask_ref.shape
    H = x_ref.shape[1]
    L = wqkv_ref.shape[0]
    NH = N_HEADS
    DH = H // NH
    scale = 1.0 / math.sqrt(DH)

    def ln(y, g, b):
        mu = jnp.mean(y, axis=-1, keepdims=True)
        yc = y - mu
        var = jnp.mean(yc * yc, axis=-1, keepdims=True)
        return yc * jax.lax.rsqrt(var + LN_EPS) * g + b

    def gelu(y):
        # TODO(synk): HF BERT default is exact erf-GELU; tanh approximation differs slightly.
        c = math.sqrt(2.0 / math.pi)
        return 0.5 * y * (1.0 + jnp.tanh(c * (y + 0.044715 * y * y * y)))

    bias = mask_ref[...]  # [B, S] additive attention bias (-1e9 on pad keys)

    # Embedding LayerNorm (no residual -> no zero-slab DMA).
    x = ln(x_ref[...].astype(jnp.float32), emb_g_ref[...], emb_b_ref[...])

    for l in range(L):  # static unroll (L == 2)
        # Fused QKV projection: one [B*S, H] x [H, 3H] MXU push.
        qkv = jnp.dot(x, wqkv_ref[l], preferred_element_type=jnp.float32) + bqkv_ref[l]

        # Attention for every (batch, head) pair inside this same kernel.
        # All slicing is static; context is scattered into a VMEM scratch.
        for b in range(B):
            r0, r1 = b * S, (b + 1) * S
            bias_b = bias[b:b + 1, :]  # [1, S] -> broadcasts over query rows
            for h in range(NH):
                c0, c1 = h * DH, (h + 1) * DH
                qh = qkv[r0:r1, c0:c1]
                kh = qkv[r0:r1, H + c0:H + c1]
                vh = qkv[r0:r1, 2 * H + c0:2 * H + c1]
                s = jnp.dot(qh, kh.T, preferred_element_type=jnp.float32) * scale
                s = s + bias_b
                s = s - jnp.max(s, axis=-1, keepdims=True)
                p = jnp.exp(s)
                p = p * pl.reciprocal(jnp.sum(p, axis=-1, keepdims=True), approx=True)
                ctx_ref[r0:r1, c0:c1] = jnp.dot(
                    p, vh, preferred_element_type=jnp.float32)

        # Attention output projection + residual + LayerNorm (fused epilogue).
        proj = jnp.dot(ctx_ref[...], wo_ref[l],
                       preferred_element_type=jnp.float32) + bo_ref[l]
        x = ln(proj + x, ln1_g_ref[l], ln1_b_ref[l])

        # FFN (GELU) + residual + LayerNorm (fused epilogue).
        h1 = gelu(jnp.dot(x, wi_ref[l], preferred_element_type=jnp.float32) + bi_ref[l])
        h2 = jnp.dot(h1, wo2_ref[l], preferred_element_type=jnp.float32) + bo2_ref[l]
        x = ln(h2 + x, ln2_g_ref[l], ln2_b_ref[l])

    # Pooler on the [CLS] token of each sequence, then classifier into a
    # lane-dense 128-wide output slab.
    for b in range(B):
        cls_ref[b:b + 1, :] = x[b * S:b * S + 1, :]
    pooled = jnp.tanh(
        jnp.dot(cls_ref[...], pool_w_ref[...], preferred_element_type=jnp.float32)
        + pool_b_ref[...])
    # nn.Dropout(0.1): identity at inference.
    logits = jnp.dot(pooled, cls_w_ref[...],
                     preferred_element_type=jnp.float32) + cls_b_ref[...]
    o_ref[...] = logits.astype(o_ref.dtype)


# ----------------------------- parameter init --------------------------------
def init_params(key):
    def normal(k, shape, std=0.02):
        return std * jax.random.normal(k, shape, dtype=jnp.float32)

    keys = iter(jax.random.split(key, 16))
    L, H, I = N_LAYERS, HIDDEN, INTER
    return {
        "word_emb": normal(next(keys), (VOCAB, H)),
        "pos_emb": normal(next(keys), (SEQ, H)),
        "type_emb": normal(next(keys), (2, H)),
        "emb_ln_g": jnp.ones((1, H), jnp.float32),
        "emb_ln_b": jnp.zeros((1, H), jnp.float32),
        # per-layer weights pre-stacked on a leading layer axis; q/k/v fused to [H, 3H].
        "wqkv": normal(next(keys), (L, H, 3 * H)),
        "bqkv": jnp.zeros((L, 1, 3 * H), jnp.float32),
        "wo": normal(next(keys), (L, H, H)),
        "bo": jnp.zeros((L, 1, H), jnp.float32),
        "ln1_g": jnp.ones((L, 1, H), jnp.float32),
        "ln1_b": jnp.zeros((L, 1, H), jnp.float32),
        "wi": normal(next(keys), (L, H, I)),
        "bi": jnp.zeros((L, 1, I), jnp.float32),
        "wo2": normal(next(keys), (L, I, H)),
        "bo2": jnp.zeros((L, 1, H), jnp.float32),
        "ln2_g": jnp.ones((L, 1, H), jnp.float32),
        "ln2_b": jnp.zeros((L, 1, H), jnp.float32),
        "pool_w": normal(next(keys), (H, H)),
        "pool_b": jnp.zeros((1, H), jnp.float32),
        "cls_w": normal(next(keys), (H, NUM_OUTPUT)),
        "cls_b": jnp.zeros((NUM_OUTPUT,), jnp.float32),
    }


# ----------------------------- forward pass -----------------------------------
def climate_nli_forward(params, input_ids, attn_mask):
    B, S = input_ids.shape
    H = HIDDEN

    # Embedding lookups (gather) stay in plain JAX; token_type fixed to segment 0.
    x = (params["word_emb"][input_ids]
         + params["pos_emb"][None, :S, :]
         + params["type_emb"][0][None, None, :]).reshape(B * S, H)

    # Additive attention bias, [B, S] (kept in f32; -1e9 at padded keys).
    mask_bias = (1.0 - attn_mask.astype(jnp.float32)) * -1e9

    # Classifier weights padded to a lane-dense 128-wide output slab.
    cls_w = jnp.pad(params["cls_w"], ((0, 0), (0, OUT_PAD - NUM_OUTPUT)))
    cls_b = jnp.pad(params["cls_b"], (0, OUT_PAD - NUM_OUTPUT)).reshape(1, OUT_PAD)

    inputs = (
        x, mask_bias,
        params["emb_ln_g"], params["emb_ln_b"],
        params["wqkv"], params["bqkv"], params["wo"], params["bo"],
        params["ln1_g"], params["ln1_b"],
        params["wi"], params["bi"], params["wo2"], params["bo2"],
        params["ln2_g"], params["ln2_b"],
        params["pool_w"], params["pool_b"], cls_w, cls_b,
    )

    def fullspec(shape):
        return pl.BlockSpec(shape, lambda i: (0,) * len(shape))

    logits_pad = pl.pallas_call(
        _fused_bert_kernel,
        out_shape=jax.ShapeDtypeStruct((B, OUT_PAD), jnp.float32),
        grid=(1,),
        in_specs=[fullspec(a.shape) for a in inputs],
        out_specs=fullspec((B, OUT_PAD)),
        scratch_shapes=[
            pltpu.VMEM((B * S, H), jnp.float32),  # attention context accumulator
            pltpu.VMEM((B, H), jnp.float32),      # gathered [CLS] rows
        ],
        compiler_params=pltpu.CompilerParams(
            dimension_semantics=("arbitrary",),   # tiny problem: keep single-TC
        ),
    )(*inputs)

    return logits_pad[:, :NUM_OUTPUT]


# ----------------------------- driver ------------------------------------------
if __name__ == "__main__":
    key = jax.random.PRNGKey(0)
    k_params, k_ids = jax.random.split(key)

    params = init_params(k_params)
    input_ids = jax.random.randint(k_ids, (BATCH, SEQ), 0, VOCAB, dtype=jnp.int32)
    attn = jnp.ones((BATCH, SEQ), jnp.int32).at[1, 6:].set(0)  # pad tail of example 1

    fwd = jax.jit(climate_nli_forward)
    logits = fwd(params, input_ids, attn)
    jax.block_until_ready(logits)

    assert logits.shape == (BATCH, NUM_OUTPUT)
    assert bool(jnp.all(jnp.isfinite(logits)))
    print("KERNEL_OK")
</pallas_src>

<mosaic_0001>
module attributes {stable_mosaic.version = 11 : i64} {
  func.func @_fused_bert_kernel(%arg0: i32, %arg1: memref<16x32xf32, #tpu.memory_space<vmem>>, %arg2: memref<2x8xf32, #tpu.memory_space<vmem>>, %arg3: memref<1x32xf32, #tpu.memory_space<vmem>>, %arg4: memref<1x32xf32, #tpu.memory_space<vmem>>, %arg5: memref<2x32x96xf32, #tpu.memory_space<vmem>>, %arg6: memref<2x1x96xf32, #tpu.memory_space<vmem>>, %arg7: memref<2x32x32xf32, #tpu.memory_space<vmem>>, %arg8: memref<2x1x32xf32, #tpu.memory_space<vmem>>, %arg9: memref<2x1x32xf32, #tpu.memory_space<vmem>>, %arg10: memref<2x1x32xf32, #tpu.memory_space<vmem>>, %arg11: memref<2x32x64xf32, #tpu.memory_space<vmem>>, %arg12: memref<2x1x64xf32, #tpu.memory_space<vmem>>, %arg13: memref<2x64x32xf32, #tpu.memory_space<vmem>>, %arg14: memref<2x1x32xf32, #tpu.memory_space<vmem>>, %arg15: memref<2x1x32xf32, #tpu.memory_space<vmem>>, %arg16: memref<2x1x32xf32, #tpu.memory_space<vmem>>, %arg17: memref<32x32xf32, #tpu.memory_space<vmem>>, %arg18: memref<1x32xf32, #tpu.memory_space<vmem>>, %arg19: memref<32x128xf32, #tpu.memory_space<vmem>>, %arg20: memref<1x128xf32, #tpu.memory_space<vmem>>, %arg21: memref<2x128xf32, #tpu.memory_space<vmem>>, %arg22: memref<16x32xf32, #tpu.memory_space<vmem>>, %arg23: memref<2x32xf32, #tpu.memory_space<vmem>>) attributes {dimension_semantics = [#tpu.dimension_semantics<arbitrary>], iteration_bounds = array<i64: 1>, scalar_prefetch = 0 : i64, scratch_operands = 2 : i64, tpu.core_type = #tpu.core_type<tc>, window_params = [{pipeline_mode = #tpu.pipeline_mode<synchronous>, transform_indices = @transform_0, window_bounds = array<i64: 16, 32>}, {pipeline_mode = #tpu.pipeline_mode<synchronous>, transform_indices = @transform_1, window_bounds = array<i64: 2, 8>}, {pipeline_mode = #tpu.pipeline_mode<synchronous>, transform_indices = @transform_2, window_bounds = array<i64: 1, 32>}, {pipeline_mode = #tpu.pipeline_mode<synchronous>, transform_indices = @transform_3, window_bounds = array<i64: 1, 32>}, {pipeline_mode = #tpu.pipeline_mode<synchronous>, transform_indices = @transform_4, window_bounds = array<i64: 2, 32, 96>}, {pipeline_mode = #tpu.pipeline_mode<synchronous>, transform_indices = @transform_5, window_bounds = array<i64: 2, 1, 96>}, {pipeline_mode = #tpu.pipeline_mode<synchronous>, transform_indices = @transform_6, window_bounds = array<i64: 2, 32, 32>}, {pipeline_mode = #tpu.pipeline_mode<synchronous>, transform_indices = @transform_7, window_bounds = array<i64: 2, 1, 32>}, {pipeline_mode = #tpu.pipeline_mode<synchronous>, transform_indices = @transform_8, window_bounds = array<i64: 2, 1, 32>}, {pipeline_mode = #tpu.pipeline_mode<synchronous>, transform_indices = @transform_9, window_bounds = array<i64: 2, 1, 32>}, {pipeline_mode = #tpu.pipeline_mode<synchronous>, transform_indices = @transform_10, window_bounds = array<i64: 2, 32, 64>}, {pipeline_mode = #tpu.pipeline_mode<synchronous>, transform_indices = @transform_11, window_bounds = array<i64: 2, 1, 64>}, {pipeline_mode = #tpu.pipeline_mode<synchronous>, transform_indices = @transform_12, window_bounds = array<i64: 2, 64, 32>}, {pipeline_mode = #tpu.pipeline_mode<synchronous>, transform_indices = @transform_13, window_bounds = array<i64: 2, 1, 32>}, {pipeline_mode = #tpu.pipeline_mode<synchronous>, transform_indices = @transform_14, window_bounds = array<i64: 2, 1, 32>}, {pipeline_mode = #tpu.pipeline_mode<synchronous>, transform_indices = @transform_15, window_bounds = array<i64: 2, 1, 32>}, {pipeline_mode = #tpu.pipeline_mode<synchronous>, transform_indices = @transform_16, window_bounds = array<i64: 32, 32>}, {pipeline_mode = #tpu.pipeline_mode<synchronous>, transform_indices = @transform_17, window_bounds = array<i64: 1, 32>}, {pipeline_mode = #tpu.pipeline_mode<synchronous>, transform_indices = @transform_18, window_bounds = array<i64: 32, 128>}, {pipeline_mode = #tpu.pipeline_mode<synchronous>, transform_indices = @transform_19, window_bounds = array<i64: 1, 128>}, {pipeline_mode = #tpu.pipeline_mode<synchronous>, transform_indices = @transform_20, window_bounds = array<i64: 2, 128>}]} {
    %c0 = arith.constant 0 : index
    %c0_0 = arith.constant 0 : index
    %0 = vector.load %arg2[%c0, %c0_0] : memref<2x8xf32, #tpu.memory_space<vmem>>, vector<2x8xf32>
    %c0_1 = arith.constant 0 : index
    %c0_2 = arith.constant 0 : index
    %1 = vector.load %arg1[%c0_1, %c0_2] : memref<16x32xf32, #tpu.memory_space<vmem>>, vector<16x32xf32>
    %c0_3 = arith.constant 0 : index
    %c0_4 = arith.constant 0 : index
    %2 = vector.load %arg3[%c0_3, %c0_4] : memref<1x32xf32, #tpu.memory_space<vmem>>, vector<1x32xf32>
    %c0_5 = arith.constant 0 : index
    %c0_6 = arith.constant 0 : index
    %3 = vector.load %arg4[%c0_5, %c0_6] : memref<1x32xf32, #tpu.memory_space<vmem>>, vector<1x32xf32>
    %cst = arith.constant dense<0.000000e+00> : vector<16xf32>
    %4 = vector.multi_reduction <add>, %1, %cst [1] : vector<16x32xf32> to vector<16xf32>
    %5 = vector.shape_cast %4 : vector<16xf32> to vector<16x1xf32>
    %cst_7 = arith.constant 3.200000e+01 : f32
    %6 = vector.broadcast %cst_7 : f32 to vector<16x1xf32>
    %7 = arith.divf %5, %6 : vector<16x1xf32>
    %8 = vector.broadcast %7 : vector<16x1xf32> to vector<16x32xf32>
    %9 = arith.subf %1, %8 : vector<16x32xf32>
    %10 = arith.mulf %9, %9 : vector<16x32xf32>
    %cst_8 = arith.constant dense<0.000000e+00> : vector<16xf32>
    %11 = vector.multi_reduction <add>, %10, %cst_8 [1] : vector<16x32xf32> to vector<16xf32>
    %12 = vector.shape_cast %11 : vector<16xf32> to vector<16x1xf32>
    %cst_9 = arith.constant 3.200000e+01 : f32
    %13 = vector.broadcast %cst_9 : f32 to vector<16x1xf32>
    %14 = arith.divf %12, %13 : vector<16x1xf32>
    %cst_10 = arith.constant 9.99999996E-13 : f32
    %15 = vector.broadcast %cst_10 : f32 to vector<16x1xf32>
    %16 = arith.addf %14, %15 : vector<16x1xf32>
    %17 = math.rsqrt %16 : vector<16x1xf32>
    %18 = vector.broadcast %17 : vector<16x1xf32> to vector<16x32xf32>
    %19 = arith.mulf %9, %18 : vector<16x32xf32>
    %20 = vector.broadcast %2 : vector<1x32xf32> to vector<16x32xf32>
    %21 = arith.mulf %19, %20 : vector<16x32xf32>
    %22 = vector.broadcast %3 : vector<1x32xf32> to vector<16x32xf32>
    %23 = arith.addf %21, %22 : vector<16x32xf32>
    %c0_11 = arith.constant 0 : index
    %c0_12 = arith.constant 0 : index
    %c0_13 = arith.constant 0 : index
    %24 = vector.load %arg5[%c0_11, %c0_12, %c0_13] : memref<2x32x96xf32, #tpu.memory_space<vmem>>, vector<1x32x96xf32>
    %25 = vector.shape_cast %24 : vector<1x32x96xf32> to vector<32x96xf32>
    %cst_14 = arith.constant dense<0.000000e+00> : vector<16x96xf32>
    %26 = tpu.matmul %23, %25, %cst_14 {dimension_numbers = #tpu.dot_dimension_numbers<[1], [0], [0], [1], [0, 0, 1, 1], [], []>} : vector<16x32xf32>, vector<32x96xf32>, vector<16x96xf32> -> vector<16x96xf32>
    %c0_15 = arith.constant 0 : index
    %c0_16 = arith.constant 0 : index
    %c0_17 = arith.constant 0 : index
    %27 = vector.load %arg6[%c0_15, %c0_16, %c0_17] : memref<2x1x96xf32, #tpu.memory_space<vmem>>, vector<1x1x96xf32>
    %28 = vector.shape_cast %27 : vector<1x1x96xf32> to vector<1x96xf32>
    %29 = vector.broadcast %28 : vector<1x96xf32> to vector<16x96xf32>
    %30 = arith.addf %26, %29 : vector<16x96xf32>
    %31 = vector.extract_strided_slice %0 {offsets = [0, 0], sizes = [1, 8], strides = [1, 1]} : vector<2x8xf32> to vector<1x8xf32>
    %32 = vector.extract_strided_slice %30 {offsets = [0, 0], sizes = [8, 16], strides = [1, 1]} : vector<16x96xf32> to vector<8x16xf32>
    %33 = vector.extract_strided_slice %30 {offsets = [0, 32], sizes = [8, 16], strides = [1, 1]} : vector<16x96xf32> to vector<8x16xf32>
    %34 = vector.extract_strided_slice %30 {offsets = [0, 64], sizes = [8, 16], strides = [1, 1]} : vector<16x96xf32> to vector<8x16xf32>
    %35 = tpu.transpose %33, [1, 0] : vector<8x16xf32> -> vector<16x8xf32>
    %cst_18 = arith.constant dense<0.000000e+00> : vector<8x8xf32>
    %36 = tpu.matmul %32, %35, %cst_18 {dimension_numbers = #tpu.dot_dimension_numbers<[1], [0], [0], [1], [0, 0, 1, 1], [], []>} : vector<8x16xf32>, vector<16x8xf32>, vector<8x8xf32> -> vector<8x8xf32>
    %cst_19 = arith.constant 2.500000e-01 : f32
    %37 = vector.broadcast %cst_19 : f32 to vector<8x8xf32>
    %38 = arith.mulf %36, %37 : vector<8x8xf32>
    %39 = vector.broadcast %31 : vector<1x8xf32> to vector<8x8xf32>
    %40 = arith.addf %38, %39 : vector<8x8xf32>
    %cst_20 = arith.constant dense<0xFF800000> : vector<8xf32>
    %41 = vector.multi_reduction <maximumf>, %40, %cst_20 [1] : vector<8x8xf32> to vector<8xf32>
    %42 = vector.shape_cast %41 : vector<8xf32> to vector<8x1xf32>
    %43 = vector.broadcast %42 : vector<8x1xf32> to vector<8x8xf32>
    %44 = arith.subf %40, %43 : vector<8x8xf32>
    %45 = math.exp %44 : vector<8x8xf32>
    %cst_21 = arith.constant dense<0.000000e+00> : vector<8xf32>
    %46 = vector.multi_reduction <add>, %45, %cst_21 [1] : vector<8x8xf32> to vector<8xf32>
    %47 = vector.shape_cast %46 : vector<8xf32> to vector<8x1xf32>
    %48 = tpu.reciprocal %47 {approx = true} : vector<8x1xf32> -> vector<8x1xf32>
    %49 = vector.broadcast %48 : vector<8x1xf32> to vector<8x8xf32>
    %50 = arith.mulf %45, %49 : vector<8x8xf32>
    %cst_22 = arith.constant dense<0.000000e+00> : vector<8x16xf32>
    %51 = tpu.matmul %50, %34, %cst_22 {dimension_numbers = #tpu.dot_dimension_numbers<[1], [0], [0], [1], [0, 0, 1, 1], [], []>} : vector<8x8xf32>, vector<8x16xf32>, vector<8x16xf32> -> vector<8x16xf32>
    %c0_23 = arith.constant 0 : index
    %c0_24 = arith.constant 0 : index
    %52 = vector.load %arg22[%c0_23, %c0_24] : memref<16x32xf32, #tpu.memory_space<vmem>>, vector<8x16xf32>
    tpu.vector_store %arg22[%c0_23, %c0_24], %51 {strides = array<i32>} : memref<16x32xf32, #tpu.memory_space<vmem>>, vector<8x16xf32>,
    %53 = vector.extract_strided_slice %30 {offsets = [0, 16], sizes = [8, 16], strides = [1, 1]} : vector<16x96xf32> to vector<8x16xf32>
    %54 = vector.extract_strided_slice %30 {offsets = [0, 48], sizes = [8, 16], strides = [1, 1]} : vector<16x96xf32> to vector<8x16xf32>
    %55 = vector.extract_strided_slice %30 {offsets = [0, 80], sizes = [8, 16], strides = [1, 1]} : vector<16x96xf32> to vector<8x16xf32>
    %56 = tpu.transpose %54, [1, 0] : vector<8x16xf32> -> vector<16x8xf32>
    %cst_25 = arith.constant dense<0.000000e+00> : vector<8x8xf32>
    %57 = tpu.matmul %53, %56, %cst_25 {dimension_numbers = #tpu.dot_dimension_numbers<[1], [0], [0], [1], [0, 0, 1, 1], [], []>} : vector<8x16xf32>, vector<16x8xf32>, vector<8x8xf32> -> vector<8x8xf32>
    %cst_26 = arith.constant 2.500000e-01 : f32
    %58 = vector.broadcast %cst_26 : f32 to vector<8x8xf32>
    %59 = arith.mulf %57, %58 : vector<8x8xf32>
    %60 = vector.broadcast %31 : vector<1x8xf32> to vector<8x8xf32>
    %61 = arith.addf %59, %60 : vector<8x8xf32>
    %cst_27 = arith.constant dense<0xFF800000> : vector<8xf32>
    %62 = vector.multi_reduction <maximumf>, %61, %cst_27 [1] : vector<8x8xf32> to vector<8xf32>
    %63 = vector.shape_cast %62 : vector<8xf32> to vector<8x1xf32>
    %64 = vector.broadcast %63 : vector<8x1xf32> to vector<8x8xf32>
    %65 = arith.subf %61, %64 : vector<8x8xf32>
    %66 = math.exp %65 : vector<8x8xf32>
    %cst_28 = arith.constant dense<0.000000e+00> : vector<8xf32>
    %67 = vector.multi_reduction <add>, %66, %cst_28 [1] : vector<8x8xf32> to vector<8xf32>
    %68 = vector.shape_cast %67 : vector<8xf32> to vector<8x1xf32>
    %69 = tpu.reciprocal %68 {approx = true} : vector<8x1xf32> -> vector<8x1xf32>
    %70 = vector.broadcast %69 : vector<8x1xf32> to vector<8x8xf32>
    %71 = arith.mulf %66, %70 : vector<8x8xf32>
    %cst_29 = arith.constant dense<0.000000e+00> : vector<8x16xf32>
    %72 = tpu.matmul %71, %55, %cst_29 {dimension_numbers = #tpu.dot_dimension_numbers<[1], [0], [0], [1], [0, 0, 1, 1], [], []>} : vector<8x8xf32>, vector<8x16xf32>, vector<8x16xf32> -> vector<8x16xf32>
    %c0_30 = arith.constant 0 : index
    %c16 = arith.constant 16 : index
    %73 = vector.load %arg22[%c0_30, %c16] : memref<16x32xf32, #tpu.memory_space<vmem>>, vector<8x16xf32>
    tpu.vector_store %arg22[%c0_30, %c16], %72 {strides = array<i32>} : memref<16x32xf32, #tpu.memory_space<vmem>>, vector<8x16xf32>,
    %74 = vector.extract_strided_slice %0 {offsets = [1, 0], sizes = [1, 8], strides = [1, 1]} : vector<2x8xf32> to vector<1x8xf32>
    %75 = vector.extract_strided_slice %30 {offsets = [8, 0], sizes = [8, 16], strides = [1, 1]} : vector<16x96xf32> to vector<8x16xf32>
    %76 = vector.extract_strided_slice %30 {offsets = [8, 32], sizes = [8, 16], strides = [1, 1]} : vector<16x96xf32> to vector<8x16xf32>
    %77 = vector.extract_strided_slice %30 {offsets = [8, 64], sizes = [8, 16], strides = [1, 1]} : vector<16x96xf32> to vector<8x16xf32>
    %78 = tpu.transpose %76, [1, 0] : vector<8x16xf32> -> vector<16x8xf32>
    %cst_31 = arith.constant dense<0.000000e+00> : vector<8x8xf32>
    %79 = tpu.matmul %75, %78, %cst_31 {dimension_numbers = #tpu.dot_dimension_numbers<[1], [0], [0], [1], [0, 0, 1, 1], [], []>} : vector<8x16xf32>, vector<16x8xf32>, vector<8x8xf32> -> vector<8x8xf32>
    %cst_32 = arith.constant 2.500000e-01 : f32
    %80 = vector.broadcast %cst_32 : f32 to vector<8x8xf32>
    %81 = arith.mulf %79, %80 : vector<8x8xf32>
    %82 = vector.broadcast %74 : vector<1x8xf32> to vector<8x8xf32>
    %83 = arith.addf %81, %82 : vector<8x8xf32>
    %cst_33 = arith.constant dense<0xFF800000> : vector<8xf32>
    %84 = vector.multi_reduction <maximumf>, %83, %cst_33 [1] : vector<8x8xf32> to vector<8xf32>
    %85 = vector.shape_cast %84 : vector<8xf32> to vector<8x1xf32>
    %86 = vector.broadcast %85 : vector<8x1xf32> to vector<8x8xf32>
    %87 = arith.subf %83, %86 : vector<8x8xf32>
    %88 = math.exp %87 : vector<8x8xf32>
    %cst_34 = arith.constant dense<0.000000e+00> : vector<8xf32>
    %89 = vector.multi_reduction <add>, %88, %cst_34 [1] : vector<8x8xf32> to vector<8xf32>
    %90 = vector.shape_cast %89 : vector<8xf32> to vector<8x1xf32>
    %91 = tpu.reciprocal %90 {approx = true} : vector<8x1xf32> -> vector<8x1xf32>
    %92 = vector.broadcast %91 : vector<8x1xf32> to vector<8x8xf32>
    %93 = arith.mulf %88, %92 : vector<8x8xf32>
    %cst_35 = arith.constant dense<0.000000e+00> : vector<8x16xf32>
    %94 = tpu.matmul %93, %77, %cst_35 {dimension_numbers = #tpu.dot_dimension_numbers<[1], [0], [0], [1], [0, 0, 1, 1], [], []>} : vector<8x8xf32>, vector<8x16xf32>, vector<8x16xf32> -> vector<8x16xf32>
    %c8 = arith.constant 8 : index
    %c0_36 = arith.constant 0 : index
    %95 = vector.load %arg22[%c8, %c0_36] : memref<16x32xf32, #tpu.memory_space<vmem>>, vector<8x16xf32>
    tpu.vector_store %arg22[%c8, %c0_36], %94 {strides = array<i32>} : memref<16x32xf32, #tpu.memory_space<vmem>>, vector<8x16xf32>,
    %96 = vector.extract_strided_slice %30 {offsets = [8, 16], sizes = [8, 16], strides = [1, 1]} : vector<16x96xf32> to vector<8x16xf32>
    %97 = vector.extract_strided_slice %30 {offsets = [8, 48], sizes = [8, 16], strides = [1, 1]} : vector<16x96xf32> to vector<8x16xf32>
    %98 = vector.extract_strided_slice %30 {offsets = [8, 80], sizes = [8, 16], strides = [1, 1]} : vector<16x96xf32> to vector<8x16xf32>
    %99 = tpu.transpose %97, [1, 0] : vector<8x16xf32> -> vector<16x8xf32>
    %cst_37 = arith.constant dense<0.000000e+00> : vector<8x8xf32>
    %100 = tpu.matmul %96, %99, %cst_37 {dimension_numbers = #tpu.dot_dimension_numbers<[1], [0], [0], [1], [0, 0, 1, 1], [], []>} : vector<8x16xf32>, vector<16x8xf32>, vector<8x8xf32> -> vector<8x8xf32>
    %cst_38 = arith.constant 2.500000e-01 : f32
    %101 = vector.broadcast %cst_38 : f32 to vector<8x8xf32>
    %102 = arith.mulf %100, %101 : vector<8x8xf32>
    %103 = vector.broadcast %74 : vector<1x8xf32> to vector<8x8xf32>
    %104 = arith.addf %102, %103 : vector<8x8xf32>
    %cst_39 = arith.constant dense<0xFF800000> : vector<8xf32>
    %105 = vector.multi_reduction <maximumf>, %104, %cst_39 [1] : vector<8x8xf32> to vector<8xf32>
    %106 = vector.shape_cast %105 : vector<8xf32> to vector<8x1xf32>
    %107 = vector.broadcast %106 : vector<8x1xf32> to vector<8x8xf32>
    %108 = arith.subf %104, %107 : vector<8x8xf32>
    %109 = math.exp %108 : vector<8x8xf32>
    %cst_40 = arith.constant dense<0.000000e+00> : vector<8xf32>
    %110 = vector.multi_reduction <add>, %109, %cst_40 [1] : vector<8x8xf32> to vector<8xf32>
    %111 = vector.shape_cast %110 : vector<8xf32> to vector<8x1xf32>
    %112 = tpu.reciprocal %111 {approx = true} : vector<8x1xf32> -> vector<8x1xf32>
    %113 = vector.broadcast %112 : vector<8x1xf32> to vector<8x8xf32>
    %114 = arith.mulf %109, %113 : vector<8x8xf32>
    %cst_41 = arith.constant dense<0.000000e+00> : vector<8x16xf32>
    %115 = tpu.matmul %114, %98, %cst_41 {dimension_numbers = #tpu.dot_dimension_numbers<[1], [0], [0], [1], [0, 0, 1, 1], [], []>} : vector<8x8xf32>, vector<8x16xf32>, vector<8x16xf32> -> vector<8x16xf32>
    %c8_42 = arith.constant 8 : index
    %c16_43 = arith.constant 16 : index
    %116 = vector.load %arg22[%c8_42, %c16_43] : memref<16x32xf32, #tpu.memory_space<vmem>>, vector<8x16xf32>
    tpu.vector_store %arg22[%c8_42, %c16_43], %115 {strides = array<i32>} : memref<16x32xf32, #tpu.memory_space<vmem>>, vector<8x16xf32>,
    %c0_44 = arith.constant 0 : index
    %c0_45 = arith.constant 0 : index
    %117 = vector.load %arg22[%c0_44, %c0_45] : memref<16x32xf32, #tpu.memory_space<vmem>>, vector<16x32xf32>
    %c0_46 = arith.constant 0 : index
    %c0_47 = arith.constant 0 : index
    %c0_48 = arith.constant 0 : index
    %118 = vector.load %arg7[%c0_46, %c0_47, %c0_48] : memref<2x32x32xf32, #tpu.memory_space<vmem>>, vector<1x32x32xf32>
    %119 = vector.shape_cast %118 : vector<1x32x32xf32> to vector<32x32xf32>
    %cst_49 = arith.constant dense<0.000000e+00> : vector<16x32xf32>
    %120 = tpu.matmul %117, %119, %cst_49 {dimension_numbers = #tpu.dot_dimension_numbers<[1], [0], [0], [1], [0, 0, 1, 1], [], []>} : vector<16x32xf32>, vector<32x32xf32>, vector<16x32xf32> -> vector<16x32xf32>
    %c0_50 = arith.constant 0 : index
    %c0_51 = arith.constant 0 : index
    %c0_52 = arith.constant 0 : index
    %121 = vector.load %arg8[%c0_50, %c0_51, %c0_52] : memref<2x1x32xf32, #tpu.memory_space<vmem>>, vector<1x1x32xf32>
    %122 = vector.shape_cast %121 : vector<1x1x32xf32> to vector<1x32xf32>
    %123 = vector.broadcast %122 : vector<1x32xf32> to vector<16x32xf32>
    %124 = arith.addf %120, %123 : vector<16x32xf32>
    %125 = arith.addf %124, %23 : vector<16x32xf32>
    %c0_53 = arith.constant 0 : index
    %c0_54 = arith.constant 0 : index
    %c0_55 = arith.constant 0 : index
    %126 = vector.load %arg9[%c0_53, %c0_54, %c0_55] : memref<2x1x32xf32, #tpu.memory_space<vmem>>, vector<1x1x32xf32>
    %127 = vector.shape_cast %126 : vector<1x1x32xf32> to vector<1x32xf32>
    %c0_56 = arith.constant 0 : index
    %c0_57 = arith.constant 0 : index
    %c0_58 = arith.constant 0 : index
    %128 = vector.load %arg10[%c0_56, %c0_57, %c0_58] : memref<2x1x32xf32, #tpu.memory_space<vmem>>, vector<1x1x32xf32>
    %129 = vector.shape_cast %128 : vector<1x1x32xf32> to vector<1x32xf32>
    %cst_59 = arith.constant dense<0.000000e+00> : vector<16xf32>
    %130 = vector.multi_reduction <add>, %125, %cst_59 [1] : vector<16x32xf32> to vector<16xf32>
    %131 = vector.shape_cast %130 : vector<16xf32> to vector<16x1xf32>
    %cst_60 = arith.constant 3.200000e+01 : f32
    %132 = vector.broadcast %cst_60 : f32 to vector<16x1xf32>
    %133 = arith.divf %131, %132 : vector<16x1xf32>
    %134 = vector.broadcast %133 : vector<16x1xf32> to vector<16x32xf32>
    %135 = arith.subf %125, %134 : vector<16x32xf32>
    %136 = arith.mulf %135, %135 : vector<16x32xf32>
    %cst_61 = arith.constant dense<0.000000e+00> : vector<16xf32>
    %137 = vector.multi_reduction <add>, %136, %cst_61 [1] : vector<16x32xf32> to vector<16xf32>
    %138 = vector.shape_cast %137 : vector<16xf32> to vector<16x1xf32>
    %cst_62 = arith.constant 3.200000e+01 : f32
    %139 = vector.broadcast %cst_62 : f32 to vector<16x1xf32>
    %140 = arith.divf %138, %139 : vector<16x1xf32>
    %cst_63 = arith.constant 9.99999996E-13 : f32
    %141 = vector.broadcast %cst_63 : f32 to vector<16x1xf32>
    %142 = arith.addf %140, %141 : vector<16x1xf32>
    %143 = math.rsqrt %142 : vector<16x1xf32>
    %144 = vector.broadcast %143 : vector<16x1xf32> to vector<16x32xf32>
    %145 = arith.mulf %135, %144 : vector<16x32xf32>
    %146 = vector.broadcast %127 : vector<1x32xf32> to vector<16x32xf32>
    %147 = arith.mulf %145, %146 : vector<16x32xf32>
    %148 = vector.broadcast %129 : vector<1x32xf32> to vector<16x32xf32>
    %149 = arith.addf %147, %148 : vector<16x32xf32>
    %c0_64 = arith.constant 0 : index
    %c0_65 = arith.constant 0 : index
    %c0_66 = arith.constant 0 : index
    %150 = vector.load %arg11[%c0_64, %c0_65, %c0_66] : memref<2x32x64xf32, #tpu.memory_space<vmem>>, vector<1x32x64xf32>
    %151 = vector.shape_cast %150 : vector<1x32x64xf32> to vector<32x64xf32>
    %cst_67 = arith.constant dense<0.000000e+00> : vector<16x64xf32>
    %152 = tpu.matmul %149, %151, %cst_67 {dimension_numbers = #tpu.dot_dimension_numbers<[1], [0], [0], [1], [0, 0, 1, 1], [], []>} : vector<16x32xf32>, vector<32x64xf32>, vector<16x64xf32> -> vector<16x64xf32>
    %c0_68 = arith.constant 0 : index
    %c0_69 = arith.constant 0 : index
    %c0_70 = arith.constant 0 : index
    %153 = vector.load %arg12[%c0_68, %c0_69, %c0_70] : memref<2x1x64xf32, #tpu.memory_space<vmem>>, vector<1x1x64xf32>
    %154 = vector.shape_cast %153 : vector<1x1x64xf32> to vector<1x64xf32>
    %155 = vector.broadcast %154 : vector<1x64xf32> to vector<16x64xf32>
    %156 = arith.addf %152, %155 : vector<16x64xf32>
    %cst_71 = arith.constant 5.000000e-01 : f32
    %157 = vector.broadcast %cst_71 : f32 to vector<16x64xf32>
    %158 = arith.mulf %157, %156 : vector<16x64xf32>
    %cst_72 = arith.constant 4.471500e-02 : f32
    %159 = vector.broadcast %cst_72 : f32 to vector<16x64xf32>
    %160 = arith.mulf %159, %156 : vector<16x64xf32>
    %161 = arith.mulf %160, %156 : vector<16x64xf32>
    %162 = arith.mulf %161, %156 : vector<16x64xf32>
    %163 = arith.addf %156, %162 : vector<16x64xf32>
    %cst_73 = arith.constant 0.797884583 : f32
    %164 = vector.broadcast %cst_73 : f32 to vector<16x64xf32>
    %165 = arith.mulf %164, %163 : vector<16x64xf32>
    %166 = math.tanh %165 : vector<16x64xf32>
    %cst_74 = arith.constant 1.000000e+00 : f32
    %167 = vector.broadcast %cst_74 : f32 to vector<16x64xf32>
    %168 = arith.addf %167, %166 : vector<16x64xf32>
    %169 = arith.mulf %158, %168 : vector<16x64xf32>
    %c0_75 = arith.constant 0 : index
    %c0_76 = arith.constant 0 : index
    %c0_77 = arith.constant 0 : index
    %170 = vector.load %arg13[%c0_75, %c0_76, %c0_77] : memref<2x64x32xf32, #tpu.memory_space<vmem>>, vector<1x64x32xf32>
    %171 = vector.shape_cast %170 : vector<1x64x32xf32> to vector<64x32xf32>
    %cst_78 = arith.constant dense<0.000000e+00> : vector<16x32xf32>
    %172 = tpu.matmul %169, %171, %cst_78 {dimension_numbers = #tpu.dot_dimension_numbers<[1], [0], [0], [1], [0, 0, 1, 1], [], []>} : vector<16x64xf32>, vector<64x32xf32>, vector<16x32xf32> -> vector<16x32xf32>
    %c0_79 = arith.constant 0 : index
    %c0_80 = arith.constant 0 : index
    %c0_81 = arith.constant 0 : index
    %173 = vector.load %arg14[%c0_79, %c0_80, %c0_81] : memref<2x1x32xf32, #tpu.memory_space<vmem>>, vector<1x1x32xf32>
    %174 = vector.shape_cast %173 : vector<1x1x32xf32> to vector<1x32xf32>
    %175 = vector.broadcast %174 : vector<1x32xf32> to vector<16x32xf32>
    %176 = arith.addf %172, %175 : vector<16x32xf32>
    %177 = arith.addf %176, %149 : vector<16x32xf32>
    %c0_82 = arith.constant 0 : index
    %c0_83 = arith.constant 0 : index
    %c0_84 = arith.constant 0 : index
    %178 = vector.load %arg15[%c0_82, %c0_83, %c0_84] : memref<2x1x32xf32, #tpu.memory_space<vmem>>, vector<1x1x32xf32>
    %179 = vector.shape_cast %178 : vector<1x1x32xf32> to vector<1x32xf32>
    %c0_85 = arith.constant 0 : index
    %c0_86 = arith.constant 0 : index
    %c0_87 = arith.constant 0 : index
    %180 = vector.load %arg16[%c0_85, %c0_86, %c0_87] : memref<2x1x32xf32, #tpu.memory_space<vmem>>, vector<1x1x32xf32>
    %181 = vector.shape_cast %180 : vector<1x1x32xf32> to vector<1x32xf32>
    %cst_88 = arith.constant dense<0.000000e+00> : vector<16xf32>
    %182 = vector.multi_reduction <add>, %177, %cst_88 [1] : vector<16x32xf32> to vector<16xf32>
    %183 = vector.shape_cast %182 : vector<16xf32> to vector<16x1xf32>
    %cst_89 = arith.constant 3.200000e+01 : f32
    %184 = vector.broadcast %cst_89 : f32 to vector<16x1xf32>
    %185 = arith.divf %183, %184 : vector<16x1xf32>
    %186 = vector.broadcast %185 : vector<16x1xf32> to vector<16x32xf32>
    %187 = arith.subf %177, %186 : vector<16x32xf32>
    %188 = arith.mulf %187, %187 : vector<16x32xf32>
    %cst_90 = arith.constant dense<0.000000e+00> : vector<16xf32>
    %189 = vector.multi_reduction <add>, %188, %cst_90 [1] : vector<16x32xf32> to vector<16xf32>
    %190 = vector.shape_cast %189 : vector<16xf32> to vector<16x1xf32>
    %cst_91 = arith.constant 3.200000e+01 : f32
    %191 = vector.broadcast %cst_91 : f32 to vector<16x1xf32>
    %192 = arith.divf %190, %191 : vector<16x1xf32>
    %cst_92 = arith.constant 9.99999996E-13 : f32
    %193 = vector.broadcast %cst_92 : f32 to vector<16x1xf32>
    %194 = arith.addf %192, %193 : vector<16x1xf32>
    %195 = math.rsqrt %194 : vector<16x1xf32>
    %196 = vector.broadcast %195 : vector<16x1xf32> to vector<16x32xf32>
    %197 = arith.mulf %187, %196 : vector<16x32xf32>
    %198 = vector.broadcast %179 : vector<1x32xf32> to vector<16x32xf32>
    %199 = arith.mulf %197, %198 : vector<16x32xf32>
    %200 = vector.broadcast %181 : vector<1x32xf32> to vector<16x32xf32>
    %201 = arith.addf %199, %200 : vector<16x32xf32>
    %c1 = arith.constant 1 : index
    %c0_93 = arith.constant 0 : index
    %c0_94 = arith.constant 0 : index
    %202 = vector.load %arg5[%c1, %c0_93, %c0_94] : memref<2x32x96xf32, #tpu.memory_space<vmem>>, vector<1x32x96xf32>
    %203 = vector.shape_cast %202 : vector<1x32x96xf32> to vector<32x96xf32>
    %cst_95 = arith.constant dense<0.000000e+00> : vector<16x96xf32>
    %204 = tpu.matmul %201, %203, %cst_95 {dimension_numbers = #tpu.dot_dimension_numbers<[1], [0], [0], [1], [0, 0, 1, 1], [], []>} : vector<16x32xf32>, vector<32x96xf32>, vector<16x96xf32> -> vector<16x96xf32>
    %c1_96 = arith.constant 1 : index
    %c0_97 = arith.constant 0 : index
    %c0_98 = arith.constant 0 : index
    %205 = vector.load %arg6[%c1_96, %c0_97, %c0_98] : memref<2x1x96xf32, #tpu.memory_space<vmem>>, vector<1x1x96xf32>
    %206 = vector.shape_cast %205 : vector<1x1x96xf32> to vector<1x96xf32>
    %207 = vector.broadcast %206 : vector<1x96xf32> to vector<16x96xf32>
    %208 = arith.addf %204, %207 : vector<16x96xf32>
    %209 = vector.extract_strided_slice %0 {offsets = [0, 0], sizes = [1, 8], strides = [1, 1]} : vector<2x8xf32> to vector<1x8xf32>
    %210 = vector.extract_strided_slice %208 {offsets = [0, 0], sizes = [8, 16], strides = [1, 1]} : vector<16x96xf32> to vector<8x16xf32>
    %211 = vector.extract_strided_slice %208 {offsets = [0, 32], sizes = [8, 16], strides = [1, 1]} : vector<16x96xf32> to vector<8x16xf32>
    %212 = vector.extract_strided_slice %208 {offsets = [0, 64], sizes = [8, 16], strides = [1, 1]} : vector<16x96xf32> to vector<8x16xf32>
    %213 = tpu.transpose %211, [1, 0] : vector<8x16xf32> -> vector<16x8xf32>
    %cst_99 = arith.constant dense<0.000000e+00> : vector<8x8xf32>
    %214 = tpu.matmul %210, %213, %cst_99 {dimension_numbers = #tpu.dot_dimension_numbers<[1], [0], [0], [1], [0, 0, 1, 1], [], []>} : vector<8x16xf32>, vector<16x8xf32>, vector<8x8xf32> -> vector<8x8xf32>
    %cst_100 = arith.constant 2.500000e-01 : f32
    %215 = vector.broadcast %cst_100 : f32 to vector<8x8xf32>
    %216 = arith.mulf %214, %215 : vector<8x8xf32>
    %217 = vector.broadcast %209 : vector<1x8xf32> to vector<8x8xf32>
    %218 = arith.addf %216, %217 : vector<8x8xf32>
    %cst_101 = arith.constant dense<0xFF800000> : vector<8xf32>
    %219 = vector.multi_reduction <maximumf>, %218, %cst_101 [1] : vector<8x8xf32> to vector<8xf32>
    %220 = vector.shape_cast %219 : vector<8xf32> to vector<8x1xf32>
    %221 = vector.broadcast %220 : vector<8x1xf32> to vector<8x8xf32>
    %222 = arith.subf %218, %221 : vector<8x8xf32>
    %223 = math.exp %222 : vector<8x8xf32>
    %cst_102 = arith.constant dense<0.000000e+00> : vector<8xf32>
    %224 = vector.multi_reduction <add>, %223, %cst_102 [1] : vector<8x8xf32> to vector<8xf32>
    %225 = vector.shape_cast %224 : vector<8xf32> to vector<8x1xf32>
    %226 = tpu.reciprocal %225 {approx = true} : vector<8x1xf32> -> vector<8x1xf32>
    %227 = vector.broadcast %226 : vector<8x1xf32> to vector<8x8xf32>
    %228 = arith.mulf %223, %227 : vector<8x8xf32>
    %cst_103 = arith.constant dense<0.000000e+00> : vector<8x16xf32>
    %229 = tpu.matmul %228, %212, %cst_103 {dimension_numbers = #tpu.dot_dimension_numbers<[1], [0], [0], [1], [0, 0, 1, 1], [], []>} : vector<8x8xf32>, vector<8x16xf32>, vector<8x16xf32> -> vector<8x16xf32>
    %c0_104 = arith.constant 0 : index
    %c0_105 = arith.constant 0 : index
    %230 = vector.load %arg22[%c0_104, %c0_105] : memref<16x32xf32, #tpu.memory_space<vmem>>, vector<8x16xf32>
    tpu.vector_store %arg22[%c0_104, %c0_105], %229 {strides = array<i32>} : memref<16x32xf32, #tpu.memory_space<vmem>>, vector<8x16xf32>,
    %231 = vector.extract_strided_slice %208 {offsets = [0, 16], sizes = [8, 16], strides = [1, 1]} : vector<16x96xf32> to vector<8x16xf32>
    %232 = vector.extract_strided_slice %208 {offsets = [0, 48], sizes = [8, 16], strides = [1, 1]} : vector<16x96xf32> to vector<8x16xf32>
    %233 = vector.extract_strided_slice %208 {offsets = [0, 80], sizes = [8, 16], strides = [1, 1]} : vector<16x96xf32> to vector<8x16xf32>
    %234 = tpu.transpose %232, [1, 0] : vector<8x16xf32> -> vector<16x8xf32>
    %cst_106 = arith.constant dense<0.000000e+00> : vector<8x8xf32>
    %235 = tpu.matmul %231, %234, %cst_106 {dimension_numbers = #tpu.dot_dimension_numbers<[1], [0], [0], [1], [0, 0, 1, 1], [], []>} : vector<8x16xf32>, vector<16x8xf32>, vector<8x8xf32> -> vector<8x8xf32>
    %cst_107 = arith.constant 2.500000e-01 : f32
    %236 = vector.broadcast %cst_107 : f32 to vector<8x8xf32>
    %237 = arith.mulf %235, %236 : vector<8x8xf32>
    %238 = vector.broadcast %209 : vector<1x8xf32> to vector<8x8xf32>
    %239 = arith.addf %237, %238 : vector<8x8xf32>
    %cst_108 = arith.constant dense<0xFF800000> : vector<8xf32>
    %240 = vector.multi_reduction <maximumf>, %239, %cst_108 [1] : vector<8x8xf32> to vector<8xf32>
    %241 = vector.shape_cast %240 : vector<8xf32> to vector<8x1xf32>
    %242 = vector.broadcast %241 : vector<8x1xf32> to vector<8x8xf32>
    %243 = arith.subf %239, %242 : vector<8x8xf32>
    %244 = math.exp %243 : vector<8x8xf32>
    %cst_109 = arith.constant dense<0.000000e+00> : vector<8xf32>
    %245 = vector.multi_reduction <add>, %244, %cst_109 [1] : vector<8x8xf32> to vector<8xf32>
    %246 = vector.shape_cast %245 : vector<8xf32> to vector<8x1xf32>
    %247 = tpu.reciprocal %246 {approx = true} : vector<8x1xf32> -> vector<8x1xf32>
    %248 = vector.broadcast %247 : vector<8x1xf32> to vector<8x8xf32>
    %249 = arith.mulf %244, %248 : vector<8x8xf32>
    %cst_110 = arith.constant dense<0.000000e+00> : vector<8x16xf32>
    %250 = tpu.matmul %249, %233, %cst_110 {dimension_numbers = #tpu.dot_dimension_numbers<[1], [0], [0], [1], [0, 0, 1, 1], [], []>} : vector<8x8xf32>, vector<8x16xf32>, vector<8x16xf32> -> vector<8x16xf32>
    %c0_111 = arith.constant 0 : index
    %c16_112 = arith.constant 16 : index
    %251 = vector.load %arg22[%c0_111, %c16_112] : memref<16x32xf32, #tpu.memory_space<vmem>>, vector<8x16xf32>
    tpu.vector_store %arg22[%c0_111, %c16_112], %250 {strides = array<i32>} : memref<16x32xf32, #tpu.memory_space<vmem>>, vector<8x16xf32>,
    %252 = vector.extract_strided_slice %0 {offsets = [1, 0], sizes = [1, 8], strides = [1, 1]} : vector<2x8xf32> to vector<1x8xf32>
    %253 = vector.extract_strided_slice %208 {offsets = [8, 0], sizes = [8, 16], strides = [1, 1]} : vector<16x96xf32> to vector<8x16xf32>
    %254 = vector.extract_strided_slice %208 {offsets = [8, 32], sizes = [8, 16], strides = [1, 1]} : vector<16x96xf32> to vector<8x16xf32>
    %255 = vector.extract_strided_slice %208 {offsets = [8, 64], sizes = [8, 16], strides = [1, 1]} : vector<16x96xf32> to vector<8x16xf32>
    %256 = tpu.transpose %254, [1, 0] : vector<8x16xf32> -> vector<16x8xf32>
    %cst_113 = arith.constant dense<0.000000e+00> : vector<8x8xf32>
    %257 = tpu.matmul %253, %256, %cst_113 {dimension_numbers = #tpu.dot_dimension_numbers<[1], [0], [0], [1], [0, 0, 1, 1], [], []>} : vector<8x16xf32>, vector<16x8xf32>, vector<8x8xf32> -> vector<8x8xf32>
    %cst_114 = arith.constant 2.500000e-01 : f32
    %258 = vector.broadcast %cst_114 : f32 to vector<8x8xf32>
    %259 = arith.mulf %257, %258 : vector<8x8xf32>
    %260 = vector.broadcast %252 : vector<1x8xf32> to vector<8x8xf32>
    %261 = arith.addf %259, %260 : vector<8x8xf32>
    %cst_115 = arith.constant dense<0xFF800000> : vector<8xf32>
    %262 = vector.multi_reduction <maximumf>, %261, %cst_115 [1] : vector<8x8xf32> to vector<8xf32>
    %263 = vector.shape_cast %262 : vector<8xf32> to vector<8x1xf32>
    %264 = vector.broadcast %263 : vector<8x1xf32> to vector<8x8xf32>
    %265 = arith.subf %261, %264 : vector<8x8xf32>
    %266 = math.exp %265 : vector<8x8xf32>
    %cst_116 = arith.constant dense<0.000000e+00> : vector<8xf32>
    %267 = vector.multi_reduction <add>, %266, %cst_116 [1] : vector<8x8xf32> to vector<8xf32>
    %268 = vector.shape_cast %267 : vector<8xf32> to vector<8x1xf32>
    %269 = tpu.reciprocal %268 {approx = true} : vector<8x1xf32> -> vector<8x1xf32>
    %270 = vector.broadcast %269 : vector<8x1xf32> to vector<8x8xf32>
    %271 = arith.mulf %266, %270 : vector<8x8xf32>
    %cst_117 = arith.constant dense<0.000000e+00> : vector<8x16xf32>
    %272 = tpu.matmul %271, %255, %cst_117 {dimension_numbers = #tpu.dot_dimension_numbers<[1], [0], [0], [1], [0, 0, 1, 1], [], []>} : vector<8x8xf32>, vector<8x16xf32>, vector<8x16xf32> -> vector<8x16xf32>
    %c8_118 = arith.constant 8 : index
    %c0_119 = arith.constant 0 : index
    %273 = vector.load %arg22[%c8_118, %c0_119] : memref<16x32xf32, #tpu.memory_space<vmem>>, vector<8x16xf32>
    tpu.vector_store %arg22[%c8_118, %c0_119], %272 {strides = array<i32>} : memref<16x32xf32, #tpu.memory_space<vmem>>, vector<8x16xf32>,
    %274 = vector.extract_strided_slice %208 {offsets = [8, 16], sizes = [8, 16], strides = [1, 1]} : vector<16x96xf32> to vector<8x16xf32>
    %275 = vector.extract_strided_slice %208 {offsets = [8, 48], sizes = [8, 16], strides = [1, 1]} : vector<16x96xf32> to vector<8x16xf32>
    %276 = vector.extract_strided_slice %208 {offsets = [8, 80], sizes = [8, 16], strides = [1, 1]} : vector<16x96xf32> to vector<8x16xf32>
    %277 = tpu.transpose %275, [1, 0] : vector<8x16xf32> -> vector<16x8xf32>
    %cst_120 = arith.constant dense<0.000000e+00> : vector<8x8xf32>
    %278 = tpu.matmul %274, %277, %cst_120 {dimension_numbers = #tpu.dot_dimension_numbers<[1], [0], [0], [1], [0, 0, 1, 1], [], []>} : vector<8x16xf32>, vector<16x8xf32>, vector<8x8xf32> -> vector<8x8xf32>
    %cst_121 = arith.constant 2.500000e-01 : f32
    %279 = vector.broadcast %cst_121 : f32 to vector<8x8xf32>
    %280 = arith.mulf %278, %279 : vector<8x8xf32>
    %281 = vector.broadcast %252 : vector<1x8xf32> to vector<8x8xf32>
    %282 = arith.addf %280, %281 : vector<8x8xf32>
    %cst_122 = arith.constant dense<0xFF800000> : vector<8xf32>
    %283 = vector.multi_reduction <maximumf>, %282, %cst_122 [1] : vector<8x8xf32> to vector<8xf32>
    %284 = vector.shape_cast %283 : vector<8xf32> to vector<8x1xf32>
    %285 = vector.broadcast %284 : vector<8x1xf32> to vector<8x8xf32>
    %286 = arith.subf %282, %285 : vector<8x8xf32>
    %287 = math.exp %286 : vector<8x8xf32>
    %cst_123 = arith.constant dense<0.000000e+00> : vector<8xf32>
    %288 = vector.multi_reduction <add>, %287, %cst_123 [1] : vector<8x8xf32> to vector<8xf32>
    %289 = vector.shape_cast %288 : vector<8xf32> to vector<8x1xf32>
    %290 = tpu.reciprocal %289 {approx = true} : vector<8x1xf32> -> vector<8x1xf32>
    %291 = vector.broadcast %290 : vector<8x1xf32> to vector<8x8xf32>
    %292 = arith.mulf %287, %291 : vector<8x8xf32>
    %cst_124 = arith.constant dense<0.000000e+00> : vector<8x16xf32>
    %293 = tpu.matmul %292, %276, %cst_124 {dimension_numbers = #tpu.dot_dimension_numbers<[1], [0], [0], [1], [0, 0, 1, 1], [], []>} : vector<8x8xf32>, vector<8x16xf32>, vector<8x16xf32> -> vector<8x16xf32>
    %c8_125 = arith.constant 8 : index
    %c16_126 = arith.constant 16 : index
    %294 = vector.load %arg22[%c8_125, %c16_126] : memref<16x32xf32, #tpu.memory_space<vmem>>, vector<8x16xf32>
    tpu.vector_store %arg22[%c8_125, %c16_126], %293 {strides = array<i32>} : memref<16x32xf32, #tpu.memory_space<vmem>>, vector<8x16xf32>,
    %c0_127 = arith.constant 0 : index
    %c0_128 = arith.constant 0 : index
    %295 = vector.load %arg22[%c0_127, %c0_128] : memref<16x32xf32, #tpu.memory_space<vmem>>, vector<16x32xf32>
    %c1_129 = arith.constant 1 : index
    %c0_130 = arith.constant 0 : index
    %c0_131 = arith.constant 0 : index
    %296 = vector.load %arg7[%c1_129, %c0_130, %c0_131] : memref<2x32x32xf32, #tpu.memory_space<vmem>>, vector<1x32x32xf32>
    %297 = vector.shape_cast %296 : vector<1x32x32xf32> to vector<32x32xf32>
    %cst_132 = arith.constant dense<0.000000e+00> : vector<16x32xf32>
    %298 = tpu.matmul %295, %297, %cst_132 {dimension_numbers = #tpu.dot_dimension_numbers<[1], [0], [0], [1], [0, 0, 1, 1], [], []>} : vector<16x32xf32>, vector<32x32xf32>, vector<16x32xf32> -> vector<16x32xf32>
    %c1_133 = arith.constant 1 : index
    %c0_134 = arith.constant 0 : index
    %c0_135 = arith.constant 0 : index
    %299 = vector.load %arg8[%c1_133, %c0_134, %c0_135] : memref<2x1x32xf32, #tpu.memory_space<vmem>>, vector<1x1x32xf32>
    %300 = vector.shape_cast %299 : vector<1x1x32xf32> to vector<1x32xf32>
    %301 = vector.broadcast %300 : vector<1x32xf32> to vector<16x32xf32>
    %302 = arith.addf %298, %301 : vector<16x32xf32>
    %303 = arith.addf %302, %201 : vector<16x32xf32>
    %c1_136 = arith.constant 1 : index
    %c0_137 = arith.constant 0 : index
    %c0_138 = arith.constant 0 : index
    %304 = vector.load %arg9[%c1_136, %c0_137, %c0_138] : memref<2x1x32xf32, #tpu.memory_space<vmem>>, vector<1x1x32xf32>
    %305 = vector.shape_cast %304 : vector<1x1x32xf32> to vector<1x32xf32>
    %c1_139 = arith.constant 1 : index
    %c0_140 = arith.constant 0 : index
    %c0_141 = arith.constant 0 : index
    %306 = vector.load %arg10[%c1_139, %c0_140, %c0_141] : memref<2x1x32xf32, #tpu.memory_space<vmem>>, vector<1x1x32xf32>
    %307 = vector.shape_cast %306 : vector<1x1x32xf32> to vector<1x32xf32>
    %cst_142 = arith.constant dense<0.000000e+00> : vector<16xf32>
    %308 = vector.multi_reduction <add>, %303, %cst_142 [1] : vector<16x32xf32> to vector<16xf32>
    %309 = vector.shape_cast %308 : vector<16xf32> to vector<16x1xf32>
    %cst_143 = arith.constant 3.200000e+01 : f32
    %310 = vector.broadcast %cst_143 : f32 to vector<16x1xf32>
    %311 = arith.divf %309, %310 : vector<16x1xf32>
    %312 = vector.broadcast %311 : vector<16x1xf32> to vector<16x32xf32>
    %313 = arith.subf %303, %312 : vector<16x32xf32>
    %314 = arith.mulf %313, %313 : vector<16x32xf32>
    %cst_144 = arith.constant dense<0.000000e+00> : vector<16xf32>
    %315 = vector.multi_reduction <add>, %314, %cst_144 [1] : vector<16x32xf32> to vector<16xf32>
    %316 = vector.shape_cast %315 : vector<16xf32> to vector<16x1xf32>
    %cst_145 = arith.constant 3.200000e+01 : f32
    %317 = vector.broadcast %cst_145 : f32 to vector<16x1xf32>
    %318 = arith.divf %316, %317 : vector<16x1xf32>
    %cst_146 = arith.constant 9.99999996E-13 : f32
    %319 = vector.broadcast %cst_146 : f32 to vector<16x1xf32>
    %320 = arith.addf %318, %319 : vector<16x1xf32>
    %321 = math.rsqrt %320 : vector<16x1xf32>
    %322 = vector.broadcast %321 : vector<16x1xf32> to vector<16x32xf32>
    %323 = arith.mulf %313, %322 : vector<16x32xf32>
    %324 = vector.broadcast %305 : vector<1x32xf32> to vector<16x32xf32>
    %325 = arith.mulf %323, %324 : vector<16x32xf32>
    %326 = vector.broadcast %307 : vector<1x32xf32> to vector<16x32xf32>
    %327 = arith.addf %325, %326 : vector<16x32xf32>
    %c1_147 = arith.constant 1 : index
    %c0_148 = arith.constant 0 : index
    %c0_149 = arith.constant 0 : index
    %328 = vector.load %arg11[%c1_147, %c0_148, %c0_149] : memref<2x32x64xf32, #tpu.memory_space<vmem>>, vector<1x32x64xf32>
    %329 = vector.shape_cast %328 : vector<1x32x64xf32> to vector<32x64xf32>
    %cst_150 = arith.constant dense<0.000000e+00> : vector<16x64xf32>
    %330 = tpu.matmul %327, %329, %cst_150 {dimension_numbers = #tpu.dot_dimension_numbers<[1], [0], [0], [1], [0, 0, 1, 1], [], []>} : vector<16x32xf32>, vector<32x64xf32>, vector<16x64xf32> -> vector<16x64xf32>
    %c1_151 = arith.constant 1 : index
    %c0_152 = arith.constant 0 : index
    %c0_153 = arith.constant 0 : index
    %331 = vector.load %arg12[%c1_151, %c0_152, %c0_153] : memref<2x1x64xf32, #tpu.memory_space<vmem>>, vector<1x1x64xf32>
    %332 = vector.shape_cast %331 : vector<1x1x64xf32> to vector<1x64xf32>
    %333 = vector.broadcast %332 : vector<1x64xf32> to vector<16x64xf32>
    %334 = arith.addf %330, %333 : vector<16x64xf32>
    %cst_154 = arith.constant 5.000000e-01 : f32
    %335 = vector.broadcast %cst_154 : f32 to vector<16x64xf32>
    %336 = arith.mulf %335, %334 : vector<16x64xf32>
    %cst_155 = arith.constant 4.471500e-02 : f32
    %337 = vector.broadcast %cst_155 : f32 to vector<16x64xf32>
    %338 = arith.mulf %337, %334 : vector<16x64xf32>
    %339 = arith.mulf %338, %334 : vector<16x64xf32>
    %340 = arith.mulf %339, %334 : vector<16x64xf32>
    %341 = arith.addf %334, %340 : vector<16x64xf32>
    %cst_156 = arith.constant 0.797884583 : f32
    %342 = vector.broadcast %cst_156 : f32 to vector<16x64xf32>
    %343 = arith.mulf %342, %341 : vector<16x64xf32>
    %344 = math.tanh %343 : vector<16x64xf32>
    %cst_157 = arith.constant 1.000000e+00 : f32
    %345 = vector.broadcast %cst_157 : f32 to vector<16x64xf32>
    %346 = arith.addf %345, %344 : vector<16x64xf32>
    %347 = arith.mulf %336, %346 : vector<16x64xf32>
    %c1_158 = arith.constant 1 : index
    %c0_159 = arith.constant 0 : index
    %c0_160 = arith.constant 0 : index
    %348 = vector.load %arg13[%c1_158, %c0_159, %c0_160] : memref<2x64x32xf32, #tpu.memory_space<vmem>>, vector<1x64x32xf32>
    %349 = vector.shape_cast %348 : vector<1x64x32xf32> to vector<64x32xf32>
    %cst_161 = arith.constant dense<0.000000e+00> : vector<16x32xf32>
    %350 = tpu.matmul %347, %349, %cst_161 {dimension_numbers = #tpu.dot_dimension_numbers<[1], [0], [0], [1], [0, 0, 1, 1], [], []>} : vector<16x64xf32>, vector<64x32xf32>, vector<16x32xf32> -> vector<16x32xf32>
    %c1_162 = arith.constant 1 : index
    %c0_163 = arith.constant 0 : index
    %c0_164 = arith.constant 0 : index
    %351 = vector.load %arg14[%c1_162, %c0_163, %c0_164] : memref<2x1x32xf32, #tpu.memory_space<vmem>>, vector<1x1x32xf32>
    %352 = vector.shape_cast %351 : vector<1x1x32xf32> to vector<1x32xf32>
    %353 = vector.broadcast %352 : vector<1x32xf32> to vector<16x32xf32>
    %354 = arith.addf %350, %353 : vector<16x32xf32>
    %355 = arith.addf %354, %327 : vector<16x32xf32>
    %c1_165 = arith.constant 1 : index
    %c0_166 = arith.constant 0 : index
    %c0_167 = arith.constant 0 : index
    %356 = vector.load %arg15[%c1_165, %c0_166, %c0_167] : memref<2x1x32xf32, #tpu.memory_space<vmem>>, vector<1x1x32xf32>
    %357 = vector.shape_cast %356 : vector<1x1x32xf32> to vector<1x32xf32>
    %c1_168 = arith.constant 1 : index
    %c0_169 = arith.constant 0 : index
    %c0_170 = arith.constant 0 : index
    %358 = vector.load %arg16[%c1_168, %c0_169, %c0_170] : memref<2x1x32xf32, #tpu.memory_space<vmem>>, vector<1x1x32xf32>
    %359 = vector.shape_cast %358 : vector<1x1x32xf32> to vector<1x32xf32>
    %cst_171 = arith.constant dense<0.000000e+00> : vector<16xf32>
    %360 = vector.multi_reduction <add>, %355, %cst_171 [1] : vector<16x32xf32> to vector<16xf32>
    %361 = vector.shape_cast %360 : vector<16xf32> to vector<16x1xf32>
    %cst_172 = arith.constant 3.200000e+01 : f32
    %362 = vector.broadcast %cst_172 : f32 to vector<16x1xf32>
    %363 = arith.divf %361, %362 : vector<16x1xf32>
    %364 = vector.broadcast %363 : vector<16x1xf32> to vector<16x32xf32>
    %365 = arith.subf %355, %364 : vector<16x32xf32>
    %366 = arith.mulf %365, %365 : vector<16x32xf32>
    %cst_173 = arith.constant dense<0.000000e+00> : vector<16xf32>
    %367 = vector.multi_reduction <add>, %366, %cst_173 [1] : vector<16x32xf32> to vector<16xf32>
    %368 = vector.shape_cast %367 : vector<16xf32> to vector<16x1xf32>
    %cst_174 = arith.constant 3.200000e+01 : f32
    %369 = vector.broadcast %cst_174 : f32 to vector<16x1xf32>
    %370 = arith.divf %368, %369 : vector<16x1xf32>
    %cst_175 = arith.constant 9.99999996E-13 : f32
    %371 = vector.broadcast %cst_175 : f32 to vector<16x1xf32>
    %372 = arith.addf %370, %371 : vector<16x1xf32>
    %373 = math.rsqrt %372 : vector<16x1xf32>
    %374 = vector.broadcast %373 : vector<16x1xf32> to vector<16x32xf32>
    %375 = arith.mulf %365, %374 : vector<16x32xf32>
    %376 = vector.broadcast %357 : vector<1x32xf32> to vector<16x32xf32>
    %377 = arith.mulf %375, %376 : vector<16x32xf32>
    %378 = vector.broadcast %359 : vector<1x32xf32> to vector<16x32xf32>
    %379 = arith.addf %377, %378 : vector<16x32xf32>
    %380 = vector.extract_strided_slice %379 {offsets = [0, 0], sizes = [1, 32], strides = [1, 1]} : vector<16x32xf32> to vector<1x32xf32>
    %c0_176 = arith.constant 0 : index
    %c0_177 = arith.constant 0 : index
    %381 = vector.load %arg23[%c0_176, %c0_177] : memref<2x32xf32, #tpu.memory_space<vmem>>, vector<1x32xf32>
    tpu.vector_store %arg23[%c0_176, %c0_177], %380 {strides = array<i32>} : memref<2x32xf32, #tpu.memory_space<vmem>>, vector<1x32xf32>,
    %382 = vector.extract_strided_slice %379 {offsets = [8, 0], sizes = [1, 32], strides = [1, 1]} : vector<16x32xf32> to vector<1x32xf32>
    %c1_178 = arith.constant 1 : index
    %c0_179 = arith.constant 0 : index
    %383 = vector.load %arg23[%c1_178, %c0_179] : memref<2x32xf32, #tpu.memory_space<vmem>>, vector<1x32xf32>
    tpu.vector_store %arg23[%c1_178, %c0_179], %382 {strides = array<i32>} : memref<2x32xf32, #tpu.memory_space<vmem>>, vector<1x32xf32>,
    %c0_180 = arith.constant 0 : index
    %c0_181 = arith.constant 0 : index
    %384 = vector.load %arg23[%c0_180, %c0_181] : memref<2x32xf32, #tpu.memory_space<vmem>>, vector<2x32xf32>
    %c0_182 = arith.constant 0 : index
    %c0_183 = arith.constant 0 : index
    %385 = vector.load %arg17[%c0_182, %c0_183] : memref<32x32xf32, #tpu.memory_space<vmem>>, vector<32x32xf32>
    %cst_184 = arith.constant dense<0.000000e+00> : vector<2x32xf32>
    %386 = tpu.matmul %384, %385, %cst_184 {dimension_numbers = #tpu.dot_dimension_numbers<[1], [0], [0], [1], [0, 0, 1, 1], [], []>} : vector<2x32xf32>, vector<32x32xf32>, vector<2x32xf32> -> vector<2x32xf32>
    %c0_185 = arith.constant 0 : index
    %c0_186 = arith.constant 0 : index
    %387 = vector.load %arg18[%c0_185, %c0_186] : memref<1x32xf32, #tpu.memory_space<vmem>>, vector<1x32xf32>
    %388 = vector.broadcast %387 : vector<1x32xf32> to vector<2x32xf32>
    %389 = arith.addf %386, %388 : vector<2x32xf32>
    %390 = math.tanh %389 : vector<2x32xf32>
    %c0_187 = arith.constant 0 : index
    %c0_188 = arith.constant 0 : index
    %391 = vector.load %arg19[%c0_187, %c0_188] : memref<32x128xf32, #tpu.memory_space<vmem>>, vector<32x128xf32>
    %cst_189 = arith.constant dense<0.000000e+00> : vector<2x128xf32>
    %392 = tpu.matmul %390, %391, %cst_189 {dimension_numbers = #tpu.dot_dimension_numbers<[1], [0], [0], [1], [0, 0, 1, 1], [], []>} : vector<2x32xf32>, vector<32x128xf32>, vector<2x128xf32> -> vector<2x128xf32>
    %c0_190 = arith.constant 0 : index
    %c0_191 = arith.constant 0 : index
    %393 = vector.load %arg20[%c0_190, %c0_191] : memref<1x128xf32, #tpu.memory_space<vmem>>, vector<1x128xf32>
    %394 = vector.broadcast %393 : vector<1x128xf32> to vector<2x128xf32>
    %395 = arith.addf %392, %394 : vector<2x128xf32>
    %c0_192 = arith.constant 0 : index
    %c0_193 = arith.constant 0 : index
    %396 = vector.load %arg21[%c0_192, %c0_193] : memref<2x128xf32, #tpu.memory_space<vmem>>, vector<2x128xf32>
    tpu.vector_store %arg21[%c0_192, %c0_193], %395 {strides = array<i32>} : memref<2x128xf32, #tpu.memory_space<vmem>>, vector<2x128xf32>,
    return
  }
  func.func @transform_0(%arg0: i32) -> (i32, i32) {
    %c0_i32 = arith.constant 0 : i32
    %c0_i32_0 = arith.constant 0 : i32
    %c0_i32_1 = arith.constant 0 : i32
    return %c0_i32, %c0_i32_0 : i32, i32
  }
  func.func @transform_1(%arg0: i32) -> (i32, i32) {
    %c0_i32 = arith.constant 0 : i32
    %c0_i32_0 = arith.constant 0 : i32
    %c0_i32_1 = arith.constant 0 : i32
    return %c0_i32, %c0_i32_0 : i32, i32
  }
  func.func @transform_2(%arg0: i32) -> (i32, i32) {
    %c0_i32 = arith.constant 0 : i32
    %c0_i32_0 = arith.constant 0 : i32
    %c0_i32_1 = arith.constant 0 : i32
    return %c0_i32, %c0_i32_0 : i32, i32
  }
  func.func @transform_3(%arg0: i32) -> (i32, i32) {
    %c0_i32 = arith.constant 0 : i32
    %c0_i32_0 = arith.constant 0 : i32
    %c0_i32_1 = arith.constant 0 : i32
    return %c0_i32, %c0_i32_0 : i32, i32
  }
  func.func @transform_4(%arg0: i32) -> (i32, i32, i32) {
    %c0_i32 = arith.constant 0 : i32
    %c0_i32_0 = arith.constant 0 : i32
    %c0_i32_1 = arith.constant 0 : i32
    %c0_i32_2 = arith.constant 0 : i32
    return %c0_i32, %c0_i32_0, %c0_i32_1 : i32, i32, i32
  }
  func.func @transform_5(%arg0: i32) -> (i32, i32, i32) {
    %c0_i32 = arith.constant 0 : i32
    %c0_i32_0 = arith.constant 0 : i32
    %c0_i32_1 = arith.constant 0 : i32
    %c0_i32_2 = arith.constant 0 : i32
    return %c0_i32, %c0_i32_0, %c0_i32_1 : i32, i32, i32
  }
  func.func @transform_6(%arg0: i32) -> (i32, i32, i32) {
    %c0_i32 = arith.constant 0 : i32
    %c0_i32_0 = arith.constant 0 : i32
    %c0_i32_1 = arith.constant 0 : i32
    %c0_i32_2 = arith.constant 0 : i32
    return %c0_i32, %c0_i32_0, %c0_i32_1 : i32, i32, i32
  }
  func.func @transform_7(%arg0: i32) -> (i32, i32, i32) {
    %c0_i32 = arith.constant 0 : i32
    %c0_i32_0 = arith.constant 0 : i32
    %c0_i32_1 = arith.constant 0 : i32
    %c0_i32_2 = arith.constant 0 : i32
    return %c0_i32, %c0_i32_0, %c0_i32_1 : i32, i32, i32
  }
  func.func @transform_8(%arg0: i32) -> (i32, i32, i32) {
    %c0_i32 = arith.constant 0 : i32
    %c0_i32_0 = arith.constant 0 : i32
    %c0_i32_1 = arith.constant 0 : i32
    %c0_i32_2 = arith.constant 0 : i32
    return %c0_i32, %c0_i32_0, %c0_i32_1 : i32, i32, i32
  }
  func.func @transform_9(%arg0: i32) -> (i32, i32, i32) {
    %c0_i32 = arith.constant 0 : i32
    %c0_i32_0 = arith.constant 0 : i32
    %c0_i32_1 = arith.constant 0 : i32
    %c0_i32_2 = arith.constant 0 : i32
    return %c0_i32, %c0_i32_0, %c0_i32_1 : i32, i32, i32
  }
  func.func @transform_10(%arg0: i32) -> (i32, i32, i32) {
    %c0_i32 = arith.constant 0 : i32
    %c0_i32_0 = arith.constant 0 : i32
    %c0_i32_1 = arith.constant 0 : i32
    %c0_i32_2 = arith.constant 0 : i32
    return %c0_i32, %c0_i32_0, %c0_i32_1 : i32, i32, i32
  }
  func.func @transform_11(%arg0: i32) -> (i32, i32, i32) {
    %c0_i32 = arith.constant 0 : i32
    %c0_i32_0 = arith.constant 0 : i32
    %c0_i32_1 = arith.constant 0 : i32
    %c0_i32_2 = arith.constant 0 : i32
    return %c0_i32, %c0_i32_0, %c0_i32_1 : i32, i32, i32
  }
  func.func @transform_12(%arg0: i32) -> (i32, i32, i32) {
    %c0_i32 = arith.constant 0 : i32
    %c0_i32_0 = arith.constant 0 : i32
    %c0_i32_1 = arith.constant 0 : i32
    %c0_i32_2 = arith.constant 0 : i32
    return %c0_i32, %c0_i32_0, %c0_i32_1 : i32, i32, i32
  }
  func.func @transform_13(%arg0: i32) -> (i32, i32, i32) {
    %c0_i32 = arith.constant 0 : i32
    %c0_i32_0 = arith.constant 0 : i32
    %c0_i32_1 = arith.constant 0 : i32
    %c0_i32_2 = arith.constant 0 : i32
    return %c0_i32, %c0_i32_0, %c0_i32_1 : i32, i32, i32
  }
  func.func @transform_14(%arg0: i32) -> (i32, i32, i32) {
    %c0_i32 = arith.constant 0 : i32
    %c0_i32_0 = arith.constant 0 : i32
    %c0_i32_1 = arith.constant 0 : i32
    %c0_i32_2 = arith.constant 0 : i32
    return %c0_i32, %c0_i32_0, %c0_i32_1 : i32, i32, i32
  }
  func.func @transform_15(%arg0: i32) -> (i32, i32, i32) {
    %c0_i32 = arith.constant 0 : i32
    %c0_i32_0 = arith.constant 0 : i32
    %c0_i32_1 = arith.constant 0 : i32
    %c0_i32_2 = arith.constant 0 : i32
    return %c0_i32, %c0_i32_0, %c0_i32_1 : i32, i32, i32
  }
  func.func @transform_16(%arg0: i32) -> (i32, i32) {
    %c0_i32 = arith.constant 0 : i32
    %c0_i32_0 = arith.constant 0 : i32
    %c0_i32_1 = arith.constant 0 : i32
    return %c0_i32, %c0_i32_0 : i32, i32
  }
  func.func @transform_17(%arg0: i32) -> (i32, i32) {
    %c0_i32 = arith.constant 0 : i32
    %c0_i32_0 = arith.constant 0 : i32
    %c0_i32_1 = arith.constant 0 : i32
    return %c0_i32, %c0_i32_0 : i32, i32
  }
  func.func @transform_18(%arg0: i32) -> (i32, i32) {
    %c0_i32 = arith.constant 0 : i32
    %c0_i32_0 = arith.constant 0 : i32
    %c0_i32_1 = arith.constant 0 : i32
    return %c0_i32, %c0_i32_0 : i32, i32
  }
  func.func @transform_19(%arg0: i32) -> (i32, i32) {
    %c0_i32 = arith.constant 0 : i32
    %c0_i32_0 = arith.constant 0 : i32
    %c0_i32_1 = arith.constant 0 : i32
    return %c0_i32, %c0_i32_0 : i32, i32
  }
  func.func @transform_20(%arg0: i32) -> (i32, i32) {
    %c0_i32 = arith.constant 0 : i32
    %c0_i32_0 = arith.constant 0 : i32
    %c0_i32_1 = arith.constant 0 : i32
    return %c0_i32, %c0_i32_0 : i32, i32
  }
}

</mosaic_0001>

<bundles_post_ra>
// kernel: climate_nli_forward.1
= control target key start
LH: loop header
LB: loop body
LE: loop exit
PB: predicated region body
PF: predicated region fallthrough
CT: control target
= control target key end

     0   :  { %s3795_s0 = inlined_call_operand.vmem [shape: f32[16,32], index: 0, kind: input, shape index: {}]   ;;  %s3796_s1 = inlined_call_operand.vmem [shape: f32[2,8], index: 1, kind: input, shape index: {}]   ;;  %s3797_s2 = inlined_call_operand.vmem [shape: f32[1,32], index: 2, kind: input, shape index: {}]   ;;  %s3798_s3 = inlined_call_operand.vmem [shape: f32[1,32], index: 3, kind: input, shape index: {}]   ;;  %s3799_s4 = inlined_call_operand.vmem [shape: f32[2,32,96], index: 4, kind: input, shape index: {}]   ;;  %s3800_s5 = inlined_call_operand.vmem [shape: f32[2,1,96], index: 5, kind: input, shape index: {}]   ;;  %s3801_s6 = inlined_call_operand.vmem [shape: f32[2,32,32], index: 6, kind: input, shape index: {}]   ;;  %s3802_s7 = inlined_call_operand.vmem [shape: f32[2,1,32], index: 7, kind: input, shape index: {}]   ;;  %s3803_s8 = inlined_call_operand.vmem [shape: f32[2,1,32], index: 8, kind: input, shape index: {}]   ;;  %s3804_s9 = inlined_call_operand.vmem [shape: f32[2,1,32], index: 9, kind: input, shape index: {}]   ;;  %s3805_s10 = inlined_call_operand.vmem [shape: f32[2,32,64], index: 10, kind: input, shape index: {}]   ;;  %s3806_s11 = inlined_call_operand.vmem [shape: f32[2,1,64], index: 11, kind: input, shape index: {}]   ;;  %s3807_s12 = inlined_call_operand.vmem [shape: f32[2,64,32], index: 12, kind: input, shape index: {}]   ;;  %s3808_s13 = inlined_call_operand.vmem [shape: f32[2,1,32], index: 13, kind: input, shape index: {}]   ;;  %s3809_s14 = inlined_call_operand.vmem [shape: f32[2,1,32], index: 14, kind: input, shape index: {}]   ;;  %s3810_s15 = inlined_call_operand.vmem [shape: f32[2,1,32], index: 15, kind: input, shape index: {}]   ;;  %s3811_s16 = inlined_call_operand.vmem [shape: f32[32,32], index: 16, kind: input, shape index: {}]   ;;  %s3812_s17 = inlined_call_operand.vmem [shape: f32[1,32], index: 17, kind: input, shape index: {}]   ;;  %s3813_s18 = inlined_call_operand.vmem [shape: f32[32,128], index: 18, kind: input, shape index: {}]   ;;  %s3814_s19 = inlined_call_operand.vmem [shape: f32[1,128], index: 19, kind: input, shape index: {}]   ;;  %s3815_s20 = inlined_call_operand.hbm [shape: f32[2,128], index: 20, kind: output, shape index: {}]  }
   0x1   :  { %3822 = sst [smem:[#allocation7_spill]] %s3795_s0 }
   0x2   :  { %3823 = sst [smem:[#allocation8_spill]] %s3796_s1 }
   0x3   :  { %3824 = sst [smem:[#allocation9_spill]] %s3797_s2 }
   0x4   :  { %3825 = sst [smem:[#allocation10_spill]] %s3798_s3 }
   0x5   :  { %3826 = sst [smem:[#allocation11_spill]] %s3799_s4 }
   0x6   :  { %s3827_s23 = sld [smem:[#allocation7_spill]]  ;;  %vm71_vm0 = vcmask 261120  }
   0xc   :  { %v67_v0 = vld [vmem:[%s3827_s23] sm:$0xff]  ;;  %v68_v1 = vld [vmem:[%s3827_s23 + $0x8] sm:$0xff] }
   0xd   :  { %25 = vsyncpa [#allocation5], 0  ;;  %v72_v2 = vsel %vm71_vm0, %v67_v0, 0.0  ;;  %v75_v3 = vsel %vm71_vm0, %v68_v1, 0.0  ;;  %s3828_s26 = sld [smem:[#allocation11_spill]]  ;;  %s3829_s22 = sld [smem:[#allocation9_spill]]  ;;  %v286_v48 = vlaneseq }
   0xe   :  { %73 = vadd.xlane.f32.xlu0 %v72_v2  ;;  %s3830_s2 = sld [smem:[#allocation10_spill]]  ;;  %v3233_v36 = vmov 0.0   ;;  %vm3234_vm1 = vmmov 0   ;;  %v2653_v37 = vld [vmem:[%s3800_s5] ss:$0 sm:$0xff]  ;;  %s3235_s27 = smov 80  }
   0xf   :  { %2850 = vmatprep.subr.mxu1 %v3233_v36  ;;  %2852 = vmatprep.mubr.msk.f32.mxu1 %vm3234_vm1, %v3233_v36  ;;  %s3236_s28 = smov 96   ;;  %s3237_s4 = smov 112   ;;  %vm210_vm2 = vcmask 130048   ;;  %v287_v49 = vshrl.u32 %v286_v48, 7  ;;  %vm291_vm3 = vcmask 64512   ;;  %vm551_vm4 = vcmask 261248  }
  0x10   :  { %s3831_s0 = sld [smem:[#allocation8_spill]]  ;;  %s3238_s21 = smov 48   ;;  %vm1161_vm5 = vcmask 523264   ;;  %vm2463_vm6 = vcmask 253952  }
  0x11   :  { %v288_v50 = vsub.s32 0, %v287_v49  ;;  %v633_v60 = vsub.s32 1, %v287_v49  ;;  %s3820_s1 = smov 64  }
  0x12   :  { %76 = vadd.xlane.f32.xlu0 %v75_v3 }
  0x13   :  { %v115_v14 = vld [vmem:[%s3828_s26] sm:$0xff]  ;;  %v116_v15 = vld [vmem:[%s3828_s26 + $0x8] sm:$0xff]  ;;  %v117_v16 = vld [vmem:[%s3828_s26 + $0x10] sm:$0xff] }
  0x14   :  { %v3045_v17 = vpack.c.bf16 %v116_v15, %v115_v14  ;;  %v118_v18 = vld [vmem:[%s3828_s26 + $0x18] sm:$0xff]  ;;  %v2651_v27 = vld [vmem:[%s3829_s22] ss:$0 sm:$0xff]  ;;  %s3818_s22 = smov 16  }
  0x15   :  { %v3049_v19 = vpack.c.bf16 %v118_v18, %v117_v16  ;;  %v2652_v29 = vld [vmem:[%s3830_s2] ss:$0 sm:$0xff] }
  0x16   :  { %3046 = vmatprep.subr.bf16.mxu0 %v3045_v17  ;;  %v66_v51 = vld [vmem:[%s3831_s0] sm:$0x3] }
  0x17   :  { %3048 = vmatpush3.bf16.msra.mxu0 %v3045_v17  ;;  %v3431_v52 = vrot.slane %v66_v51, %v288_v50 }
  0x18   :  { %3050 = vmatprep.subr.bf16.mxu0 %v3049_v19 }
  0x1b   :  { %3052 = vmatpush3.bf16.msra.mxu0 %v3049_v19 }
  0x1c   :  { %2860 = vmatprep.subr.mxu0 %v3233_v36 }
  0x9b   :  { %v74_v4 = vpop.xlane.xlu0 %73 }
  0x9c   :  { %v79_v5 = vmul.f32 0.03125, %v74_v4 }
  0x9e   :  { %v81_v6 = vsub.f32 %v67_v0, %v79_v5  ;;  %v3437_v0 = vrot.slane %v66_v51, %v633_v60  ;;  %v900_v60 = vld [vmem:[%s3801_s6 + $0x10] sm:$0xff] }
  0x9f   :  { %v77_v7 = vpop.xlane.xlu0 %76 }
  0xa0   :  { %v80_v8 = vmul.f32 0.03125, %v77_v7  ;;  %v83_v9 = vmul.f32 %v81_v6, %v81_v6 }
  0xa2   :  { %v82_v10 = vsub.f32 %v68_v1, %v80_v8  ;;  %v85_v11 = vsel %vm71_vm0, %v83_v9, 0.0 }
  0xa3   :  { %86 = vadd.xlane.f32.xlu1 %v85_v11 }
  0xa4   :  { %v84_v12 = vmul.f32 %v82_v10, %v82_v10 }
  0xa6   :  { %v88_v13 = vsel %vm71_vm0, %v84_v12, 0.0 }
  0xa7   :  { %89 = vadd.xlane.f32.xlu1 %v88_v13 }
 0x130   :  { %v87_v20 = vpop.xlane.xlu1 %86 }
 0x131   :  { %v91_v21 = vmul.f32 0.03125, %v87_v20 }
 0x133   :  { %v93_v22 = vadd.f32 1e-12, %v91_v21 }
 0x134   :  { %v90_v23 = vpop.xlane.xlu1 %89 }
 0x135   :  { %3147 = vrsqrt.f32 %v93_v22  ;;  %v92_v24 = vmul.f32 0.03125, %v90_v23 }
 0x137   :  { %v94_v25 = vadd.f32 1e-12, %v92_v24 }
 0x139   :  { %3149 = vrsqrt.f32 %v94_v25 }
 0x13f   :  { %v3148_v26 = vpop.eup %3147 }
 0x140   :  { %v97_v28 = vmul.f32 %v3148_v26, %v81_v6 }
 0x142   :  { %v105_v30 = vmul.f32 %v2651_v27, %v97_v28 }
 0x143   :  { %v3150_v31 = vpop.eup %3149 }
 0x144   :  { %v98_v32 = vmul.f32 %v3150_v31, %v82_v10  ;;  %v3376_v33 = vadd.f32 %v2652_v29, %v105_v30 }
 0x146   :  { %v106_v34 = vmul.f32 %v2651_v27, %v98_v32  ;;  %2847 = vmatprep.mubr.msk.f32.mxu0 %vm71_vm0, %v3376_v33 }
 0x148   :  { %v3380_v35 = vadd.f32 %v2652_v29, %v106_v34 }
 0x14a   :  { %2848 = vmatmul.mubr.msk.f32.vlgmr.msra.gmra.mrb[0].mxu0 %vm71_vm0, %v3380_v35 }
 0x14b   :  { %2862 = vmatprep.mubr.msk.f32.mxu0 %vm3234_vm1, %v3233_v36 }
 0x21d   :  { %v2849_v38 = vpop.f32.mrb[0].mxu0 }
 0x21e   :  { %v198_v39 = vpop.f32.mrb[1].mxu0  ;;  %v3399_v41 = vadd.f32 %v2849_v38, %v2653_v37 }
 0x21f   :  { %v3393_v40 = vadd.f32 %v2653_v37, %v198_v39 }
 0x221   :  { %382 = vrot.lane.b32.xlu1 %v3393_v40, %s3235_s27  ;;  %208 = vrot.lane.b32.xlu0 %v3393_v40, %s3236_s28 }
 0x225   :  { %380 = vrot.lane.b32.xlu1 %v3393_v40, %s3237_s4  ;;  %726 = vrot.lane.b32.xlu0 %v3399_v41, %s3235_s27 }
 0x229   :  { %554 = vrot.lane.b32.xlu1 %v3399_v41, %s3236_s28 }
 0x22d   :  { %724 = vrot.lane.b32.xlu1 %v3399_v41, %s3237_s4 }
 0x293   :  { %v383_v42 = vpop.permute.xlu1 %382  ;;  %v209_v43 = vpop.permute.xlu0 %208 }
 0x294   :  { %2851 = vmatpush3.xpose.msk.msra.mxu1 %vm210_vm2, %v209_v43  ;;  %2861 = vmatpush3.xpose.msk.msra.mxu0 %vm210_vm2, %v383_v42 }
 0x295   :  { %2870 = vmatprep.subr.mxu0 %v3233_v36  ;;  %2855 = vmatprep.subr.mxu1 %v3233_v36 }
 0x297   :  { %v381_v44 = vpop.permute.xlu1 %380  ;;  %2853 = vmatmul.mubr.msk.f32.vlgmr.msra.gmra.mrb[0].mxu1 %vm210_vm2, %v3393_v40  ;;  %v727_v46 = vpop.permute.xlu0 %726 }
 0x298   :  { %2863 = vmatmul.mubr.msk.f32.vlgmr.msra.gmra.mrb[2].mxu0 %vm210_vm2, %v381_v44  ;;  %2857 = vmatprep.mubr.msk.f32.mxu1 %vm3234_vm1, %v3233_v36 }
 0x299   :  { %2872 = vmatprep.mubr.msk.f32.mxu0 %vm3234_vm1, %v3233_v36 }
 0x29b   :  { %v555_v45 = vpop.permute.xlu1 %554 }
 0x29c   :  { %2871 = vmatpush3.xpose.msk.msra.mxu0 %vm210_vm2, %v555_v45 }
 0x29d   :  { %2880 = vmatprep.subr.mxu0 %v3233_v36 }
 0x29f   :  { %2873 = vmatmul.mubr.msk.f32.vlgmr.msra.gmra.mrb[4].mxu0 %vm210_vm2, %v3399_v41  ;;  %v725_v47 = vpop.permute.xlu1 %724 }
 0x2a0   :  { %2881 = vmatpush3.xpose.msk.msra.mxu0 %vm210_vm2, %v727_v46  ;;  %2882 = vmatprep.mubr.msk.f32.mxu0 %vm3234_vm1, %v3233_v36 }
 0x2a3   :  { %2883 = vmatmul.mubr.msk.f32.vlgmr.msra.gmra.mrb[6].mxu0 %vm210_vm2, %v725_v47 }
 0x36a   :  { %v281_v53 = vpop.f32.mrb[0].mxu1 }
 0x36b   :  { %v285_v54 = vmul.f32 0.25, %v281_v53  ;;  %v2854_v55 = vpop.f32.mrb[1].mxu1  ;;  %v454_v56 = vpop.f32.mrb[2].mxu0 }
 0x36c   :  { %v458_v57 = vmul.f32 0.25, %v454_v56  ;;  %v2864_v58 = vpop.f32.mrb[3].mxu0 }
 0x36d   :  { %v290_v59 = vadd.f32 %v3431_v52, %v285_v54  ;;  %v899_v58 = vld [vmem:[%s3801_s6 + $0x8] sm:$0xff] }
 0x36e   :  { %v459_v61 = vadd.f32 %v458_v57, %v3431_v52  ;;  %v898_v57 = vld [vmem:[%s3801_s6] sm:$0xff] }
 0x36f   :  { %v292_v62 = vsel %vm291_vm3, %v290_v59, -inf }
 0x370   :  { %293 = vmax.xlane.f32.xlu0 %v292_v62  ;;  %v460_v63 = vsel %vm291_vm3, %v459_v61, -inf }
 0x371   :  { %461 = vmax.xlane.f32.xlu1 %v460_v63 }
 0x372   :  { %v626_v1 = vpop.f32.mrb[4].mxu0 }
 0x373   :  { %v630_v2 = vmul.f32 0.25, %v626_v1  ;;  %v2874_v3 = vpop.f32.mrb[5].mxu0 }
 0x375   :  { %v635_v4 = vadd.f32 %v3437_v0, %v630_v2 }
 0x376   :  { %v798_v5 = vpop.f32.mrb[6].mxu0 }
 0x377   :  { %v802_v6 = vmul.f32 0.25, %v798_v5  ;;  %v2884_v7 = vpop.f32.mrb[7].mxu0  ;;  %v636_v8 = vsel %vm291_vm3, %v635_v4, -inf }
 0x378   :  { %637 = vmax.xlane.f32.xlu0 %v636_v8 }
 0x379   :  { %v803_v9 = vadd.f32 %v802_v6, %v3437_v0  ;;  %v2668_v6 = vld [vmem:[%s3802_s7] ss:$0 sm:$0xff] }
 0x37b   :  { %v804_v10 = vsel %vm291_vm3, %v803_v9, -inf }
 0x37c   :  { %805 = vmax.xlane.f32.xlu0 %v804_v10 }
 0x3fd   :  { %v294_v11 = vpop.xlane.xlu0 %293 }
 0x3fe   :  { %v295_v12 = vsub.f32 %v290_v59, %v294_v11  ;;  %v462_v13 = vpop.xlane.xlu1 %461  ;;  %v3053_v59 = vpack.c.bf16 %v899_v58, %v898_v57  ;;  %v1152_v58 = vld [vmem:[%s3807_s12 + $0x30] sm:$0xff] }
 0x3ff   :  { %v463_v14 = vsub.f32 %v459_v61, %v462_v13  ;;  %v901_v61 = vld [vmem:[%s3801_s6 + $0x18] sm:$0xff] }
 0x400   :  { %v296_v15 = vmul.f32 1.442695, %v295_v12  ;;  %3054 = vmatprep.subr.bf16.mxu0 %v3053_v59  ;;  %v3057_v62 = vpack.c.bf16 %v901_v61, %v900_v60  ;;  %v2673_v61 = vld [vmem:[%s3806_s11] ss:$0 sm:$0xff] }
 0x401   :  { %v464_v16 = vmul.f32 1.442695, %v463_v14  ;;  %3056 = vmatpush3.bf16.msra.mxu0 %v3053_v59  ;;  %v1153_v59 = vld [vmem:[%s3807_s12 + $0x38] sm:$0xff] }
 0x402   :  { %3151 = vpow2.f32 %v296_v15  ;;  %3058 = vmatprep.subr.bf16.mxu0 %v3057_v62  ;;  %v3081_v60 = vpack.c.bf16 %v1153_v59, %v1152_v58  ;;  %v2680_v59 = vld [vmem:[%s3810_s15] ss:$0 sm:$0xff] }
 0x403   :  { %3153 = vpow2.f32 %v464_v16 }
 0x405   :  { %v638_v17 = vpop.xlane.xlu0 %637  ;;  %3060 = vmatpush3.bf16.msra.mxu0 %v3057_v62 }
 0x406   :  { %v639_v18 = vsub.f32 %v635_v4, %v638_v17 }
 0x408   :  { %v640_v19 = vmul.f32 1.442695, %v639_v18 }
 0x409   :  { %v806_v26 = vpop.xlane.xlu0 %805 }
 0x40a   :  { %3155 = vpow2.f32 %v640_v19  ;;  %v807_v27 = vsub.f32 %v803_v9, %v806_v26  ;;  %v1038_v26 = vld [vmem:[%s3805_s10 + $0x10] sm:$0xff] }
 0x40c   :  { %v3152_v20 = vpop.eup %3151  ;;  %v808_v28 = vmul.f32 1.442695, %v807_v27  ;;  %v1039_v27 = vld [vmem:[%s3805_s10 + $0x18] sm:$0xff] }
 0x40d   :  { %v3154_v21 = vpop.eup %3153  ;;  %v298_v22 = vsel %vm291_vm3, %v3152_v20, 0.0 }
 0x40e   :  { %299 = vadd.xlane.f32.xlu0 %v298_v22  ;;  %v466_v23 = vsel %vm291_vm3, %v3154_v21, 0.0  ;;  %3157 = vpow2.f32 %v808_v28  ;;  %v3065_v28 = vpack.c.bf16 %v1039_v27, %v1038_v26 }
 0x40f   :  { %467 = vadd.xlane.f32.xlu1 %v466_v23 }
 0x414   :  { %v3156_v24 = vpop.eup %3155 }
 0x415   :  { %v642_v25 = vsel %vm291_vm3, %v3156_v24, 0.0 }
 0x416   :  { %643 = vadd.xlane.f32.xlu0 %v642_v25 }
 0x418   :  { %v3158_v29 = vpop.eup %3157 }
 0x419   :  { %v810_v30 = vsel %vm291_vm3, %v3158_v29, 0.0 }
 0x420   :  { %471 = vrot.lane.b32.xlu1 %v3393_v40, %s3238_s21 }
 0x424   :  { %647 = vrot.lane.b32.xlu1 %v3399_v41, %s3820_s1 }
 0x42c   :  { %303 = vrot.lane.b32.xlu0 %v3393_v40, %s3820_s1 }
 0x448   :  { %811 = vadd.xlane.f32.xlu1 %v810_v30 }
 0x459   :  { %815 = vrot.lane.b32.xlu1 %v3399_v41, %s3238_s21 }
 0x49b   :  { %v300_v31 = vpop.xlane.xlu0 %299 }
 0x49c   :  { %3159 = vrcp.f32 %v300_v31  ;;  %v468_v32 = vpop.xlane.xlu1 %467 }
 0x49d   :  { %3161 = vrcp.f32 %v468_v32 }
 0x4a0   :  { %v472_v39 = vpop.permute.xlu1 %471 }
 0x4a3   :  { %v644_v34 = vpop.xlane.xlu0 %643 }
 0x4a4   :  { %3163 = vrcp.f32 %v644_v34  ;;  %v648_v43 = vpop.permute.xlu1 %647 }
 0x4a6   :  { %v3160_v37 = vpop.eup %3159 }
 0x4a7   :  { %v302_v38 = vmul.f32 %v3160_v37, %v3152_v20  ;;  %v304_v40 = vpop.permute.xlu0 %303  ;;  %v3162_v42 = vpop.eup %3161 }
 0x4a8   :  { %2856 = vmatpush3.msra.mxu1 %v304_v40  ;;  %v470_v41 = vmul.f32 %v3162_v42, %v3154_v21  ;;  %v2672_v42 = vld [vmem:[%s3804_s9] ss:$0 sm:$0xff] }
 0x4a9   :  { %2858 = vmatmul.mubr.msk.f32.vlgmr.msra.gmra.mrb[2].mxu1 %vm291_vm3, %v302_v38  ;;  %2865 = vmatprep.subr.mxu1 %v3233_v36 }
 0x4aa   :  { %2866 = vmatpush3.msra.mxu1 %v472_v39  ;;  %2867 = vmatprep.mubr.msk.f32.mxu1 %vm3234_vm1, %v3233_v36  ;;  %v2671_v39 = vld [vmem:[%s3803_s8] ss:$0 sm:$0xff] }
 0x4ab   :  { %2875 = vmatprep.subr.mxu1 %v3233_v36 }
 0x4ad   :  { %2868 = vmatmul.mubr.msk.f32.vlgmr.msra.gmra.mrb[4].mxu1 %vm291_vm3, %v470_v41 }
 0x4ae   :  { %v3164_v44 = vpop.eup %3163  ;;  %2876 = vmatpush3.msra.mxu1 %v648_v43  ;;  %2877 = vmatprep.mubr.msk.f32.mxu1 %vm3234_vm1, %v3233_v36 }
 0x4af   :  { %v646_v45 = vmul.f32 %v3164_v44, %v3156_v24  ;;  %2885 = vmatprep.subr.mxu1 %v3233_v36  ;;  %v1037_v24 = vld [vmem:[%s3805_s10 + $0x8] sm:$0xff] }
 0x4b1   :  { %2878 = vmatmul.mubr.msk.f32.vlgmr.msra.gmra.mrb[6].mxu1 %vm291_vm3, %v646_v45 }
 0x4b2   :  { %2887 = vmatprep.mubr.msk.f32.mxu1 %vm3234_vm1, %v3233_v36 }
 0x4d5   :  { %v812_v46 = vpop.xlane.xlu1 %811 }
 0x4d6   :  { %3165 = vrcp.f32 %v812_v46 }
 0x4d9   :  { %v816_v47 = vpop.permute.xlu1 %815 }
 0x4da   :  { %2886 = vmatpush3.msra.mxu1 %v816_v47 }
 0x4e0   :  { %v3166_v48 = vpop.eup %3165 }
 0x4e1   :  { %v814_v49 = vmul.f32 %v3166_v48, %v3158_v29  ;;  %v1146_v48 = vld [vmem:[%s3807_s12] sm:$0xff] }
 0x4e3   :  { %2888 = vmatmul.mubr.msk.f32.vlgmr.msra.gmra.mrb[8].mxu1 %vm291_vm3, %v814_v49  ;;  %v1147_v49 = vld [vmem:[%s3807_s12 + $0x8] sm:$0xff] }
 0x57c   :  { %v375_v50 = vpop.f32.mrb[2].mxu1 }
 0x57d   :  { %379 = vst.msk [vmem:[#allocation2] sm:$0xff] %vm210_vm2, %v375_v50  ;;  %v2859_v51 = vpop.f32.mrb[3].mxu1  ;;  %v3069_v50 = vpack.c.bf16 %v1147_v49, %v1146_v48 }
 0x57e   :  { %v1148_v51 = vld [vmem:[%s3807_s12 + $0x10] sm:$0xff] }
 0x57f   :  { %3070 = vmatprep.subr.bf16.mxu0 %v3069_v50 }
 0x580   :  { %v543_v53 = vpop.f32.mrb[4].mxu1 }
 0x581   :  { %548 = vrot.lane.b32.xlu0 %v543_v53, %s3818_s22  ;;  %v2869_v54 = vpop.f32.mrb[5].mxu1  ;;  %v1149_v53 = vld [vmem:[%s3807_s12 + $0x18] sm:$0xff] }
 0x582   :  { %v3073_v54 = vpack.c.bf16 %v1149_v53, %v1148_v51 }
 0x584   :  { %v719_v55 = vpop.f32.mrb[6].mxu1 }
 0x585   :  { %723 = vst.msk [vmem:[#allocation2 + $0x8] sm:$0xff] %vm210_vm2, %v719_v55  ;;  %v2879_v56 = vpop.f32.mrb[7].mxu1  ;;  %v1150_v55 = vld [vmem:[%s3807_s12 + $0x20] sm:$0xff] }
 0x586   :  { %v1151_v56 = vld [vmem:[%s3807_s12 + $0x28] sm:$0xff] }
 0x587   :  { %v3077_v57 = vpack.c.bf16 %v1151_v56, %v1150_v55  ;;  %v2679_v55 = vld [vmem:[%s3809_s14] ss:$0 sm:$0xff] }
 0x5b6   :  { %v887_v63 = vpop.f32.mrb[8].mxu1 }
 0x5b7   :  { %892 = vrot.lane.b32.xlu1 %v887_v63, %s3818_s22  ;;  %v2889_v1 = vpop.f32.mrb[9].mxu1 }
 0x5f3   :  { %v549_v2 = vpop.permute.xlu0 %548 }
 0x5f4   :  { %552 = vst.msk [vmem:[#allocation2] sm:$0xff] %vm551_vm4, %v549_v2 }
 0x5fb   :  { %v896_v3 = vld [vmem:[#allocation2] sm:$0xff] }
 0x5fc   :  { %2898 = vmatprep.mubr.msk.f32.mxu0 %vm71_vm0, %v896_v3 }
 0x629   :  { %v893_v4 = vpop.permute.xlu1 %892 }
 0x62a   :  { %895 = vst.msk [vmem:[#allocation2 + $0x8] sm:$0xff] %vm551_vm4, %v893_v4 }
 0x631   :  { %v897_v5 = vld [vmem:[#allocation2 + $0x8] sm:$0xff] }
 0x632   :  { %2899 = vmatmul.mubr.msk.f32.vlgmr.msra.gmra.mrb[8].mxu0 %vm71_vm0, %v897_v5 }
 0x633   :  { %3072 = vmatpush3.bf16.msra.mxu0 %v3069_v50 }
 0x634   :  { %3074 = vmatprep.subr.bf16.mxu0 %v3073_v54 }
 0x637   :  { %3076 = vmatpush3.bf16.msra.mxu0 %v3073_v54 }
 0x638   :  { %3078 = vmatprep.subr.bf16.mxu0 %v3077_v57 }
 0x63b   :  { %3080 = vmatpush3.bf16.msra.mxu0 %v3077_v57 }
 0x63c   :  { %3082 = vmatprep.subr.bf16.mxu0 %v3081_v60 }
 0x63f   :  { %3084 = vmatpush3.bf16.msra.mxu0 %v3081_v60 }
 0x640   :  { %2952 = vmatprep.subr.mxu0 %v3233_v36 }
 0x705   :  { %v2900_v7 = vpop.f32.mrb[8].mxu0 }
 0x706   :  { %v987_v8 = vadd.f32 %v2900_v7, %v2668_v6  ;;  %v981_v9 = vpop.f32.mrb[9].mxu0 }
 0x707   :  { %v982_v10 = vadd.f32 %v2668_v6, %v981_v9 }
 0x708   :  { %v991_v11 = vadd.f32 %v987_v8, %v3380_v35 }
 0x709   :  { %v990_v12 = vadd.f32 %v982_v10, %v3376_v33  ;;  %v1036_v33 = vld [vmem:[%s3805_s10] sm:$0xff] }
 0x70a   :  { %v997_v13 = vsel %vm71_vm0, %v991_v11, 0.0  ;;  %v3061_v25 = vpack.c.bf16 %v1037_v24, %v1036_v33 }
 0x70b   :  { %998 = vadd.xlane.f32.xlu1 %v997_v13  ;;  %v994_v14 = vsel %vm71_vm0, %v990_v12, 0.0 }
 0x70c   :  { %995 = vadd.xlane.f32.xlu0 %v994_v14  ;;  %3062 = vmatprep.subr.bf16.mxu1 %v3061_v25 }
 0x70d   :  { %3064 = vmatpush3.bf16.msra.mxu1 %v3061_v25 }
 0x70e   :  { %3066 = vmatprep.subr.bf16.mxu1 %v3065_v28 }
 0x711   :  { %3068 = vmatpush3.bf16.msra.mxu1 %v3065_v28 }
 0x798   :  { %v999_v15 = vpop.xlane.xlu1 %998 }
 0x799   :  { %v1001_v16 = vmul.f32 0.03125, %v999_v15  ;;  %v996_v17 = vpop.xlane.xlu0 %995 }
 0x79a   :  { %v1000_v18 = vmul.f32 0.03125, %v996_v17 }
 0x79b   :  { %v1003_v19 = vsub.f32 %v991_v11, %v1001_v16 }
 0x79c   :  { %v1002_v20 = vsub.f32 %v990_v12, %v1000_v18 }
 0x79d   :  { %v1005_v23 = vmul.f32 %v1003_v19, %v1003_v19 }
 0x79e   :  { %v1004_v21 = vmul.f32 %v1002_v20, %v1002_v20 }
 0x79f   :  { %v1009_v35 = vsel %vm71_vm0, %v1005_v23, 0.0 }
 0x7a0   :  { %v1006_v22 = vsel %vm71_vm0, %v1004_v21, 0.0  ;;  %v2676_v21 = vld [vmem:[%s3808_s13] ss:$0 sm:$0xff] }
 0x7a1   :  { %1007 = vadd.xlane.f32.xlu0 %v1006_v22 }
 0x7a5   :  { %1010 = vadd.xlane.f32.xlu0 %v1009_v35 }
 0x82e   :  { %v1008_v29 = vpop.xlane.xlu0 %1007 }
 0x82f   :  { %v1012_v30 = vmul.f32 0.03125, %v1008_v29 }
 0x831   :  { %v1014_v31 = vadd.f32 1e-12, %v1012_v30 }
 0x832   :  { %v1011_v32 = vpop.xlane.xlu0 %1010 }
 0x833   :  { %3167 = vrsqrt.f32 %v1014_v31  ;;  %v1013_v34 = vmul.f32 0.03125, %v1011_v32 }
 0x835   :  { %v1015_v37 = vadd.f32 1e-12, %v1013_v34 }
 0x837   :  { %3169 = vrsqrt.f32 %v1015_v37 }
 0x83d   :  { %v3168_v38 = vpop.eup %3167 }
 0x83e   :  { %v1018_v40 = vmul.f32 %v3168_v38, %v1002_v20 }
 0x840   :  { %v1026_v41 = vmul.f32 %v2671_v39, %v1018_v40 }
 0x841   :  { %v3170_v43 = vpop.eup %3169 }
 0x842   :  { %v1019_v44 = vmul.f32 %v3170_v43, %v1003_v19  ;;  %v1034_v45 = vadd.f32 %v2672_v42, %v1026_v41  ;;  %v2682_v41 = vld [vmem:[%s3828_s26 + $0x28] sm:$0xff] }
 0x844   :  { %v1027_v46 = vmul.f32 %v2671_v39, %v1019_v44  ;;  %2909 = vmatprep.mubr.msk.f32.mxu1 %vm71_vm0, %v1034_v45  ;;  %v2683_v44 = vld [vmem:[%s3828_s26 + $0x30] sm:$0xff] }
 0x846   :  { %v1035_v47 = vadd.f32 %v2672_v42, %v1027_v46  ;;  %v2681_v42 = vld [vmem:[%s3828_s26 + $0x20] sm:$0xff] }
 0x847   :  { %v3085_v43 = vpack.c.bf16 %v2682_v41, %v2681_v42 }
 0x848   :  { %2910 = vmatmul.mubr.msk.f32.vlgmr.msra.gmra.mrb[10].mxu1 %vm71_vm0, %v1035_v47 }
 0x849   :  { %3086 = vmatprep.subr.bf16.mxu1 %v3085_v43 }
 0x84a   :  { %3088 = vmatpush3.bf16.msra.mxu1 %v3085_v43 }
 0x91b   :  { %v2911_v62 = vpop.f32.mrb[10].mxu1 }
 0x91c   :  { %v1125_v63 = vadd.f32 %v2911_v62, %v2673_v61  ;;  %v1119_v1 = vpop.f32.mrb[11].mxu1 }
 0x91d   :  { %v1120_v2 = vadd.f32 %v2673_v61, %v1119_v1  ;;  %v2686_v1 = vld [vmem:[%s3800_s5 + $0x1] ss:$0 sm:$0xff]  ;;  %s3832_s5 = smov 64  }
 0x91e   :  { %v1131_v3 = vmul.f32 0.044715, %v1125_v63  ;;  %v1129_v18 = vmul.f32 0.5, %v1125_v63 }
 0x91f   :  { %v1130_v4 = vmul.f32 0.044715, %v1120_v2  ;;  %v1128_v16 = vmul.f32 0.5, %v1120_v2 }
 0x920   :  { %v1133_v5 = vmul.f32 %v1131_v3, %v1125_v63 }
 0x921   :  { %v1132_v6 = vmul.f32 %v1130_v4, %v1120_v2 }
 0x922   :  { %v1135_v7 = vmul.f32 %v1133_v5, %v1125_v63 }
 0x923   :  { %v1134_v8 = vmul.f32 %v1132_v6, %v1120_v2 }
 0x924   :  { %v1137_v9 = vadd.f32 %v1135_v7, %v1125_v63 }
 0x925   :  { %v1136_v10 = vadd.f32 %v1134_v8, %v1120_v2 }
 0x926   :  { %v1139_v11 = vmul.f32 0.7978846, %v1137_v9 }
 0x927   :  { %v1138_v12 = vmul.f32 0.7978846, %v1136_v10 }
 0x928   :  { %3171 = vtanh.f32 %v1139_v11 }
 0x929   :  { %3173 = vtanh.f32 %v1138_v12 }
 0x932   :  { %v3172_v13 = vpop.eup %3171 }
 0x933   :  { %v3174_v14 = vpop.eup %3173  ;;  %v1143_v15 = vadd.f32 1.0, %v3172_v13 }
 0x934   :  { %v1142_v17 = vadd.f32 1.0, %v3174_v14 }
 0x935   :  { %v1145_v20 = vmul.f32 %v1143_v15, %v1129_v18 }
 0x936   :  { %v1144_v19 = vmul.f32 %v1142_v17, %v1128_v16 }
 0x938   :  { %2928 = vmatprep.mubr.msk.f32.mxu0 %vm1161_vm5, %v1144_v19 }
 0x939   :  { %2929 = vmatmul.mubr.msk.f32.vlgmr.msra.gmra.mrb[10].mxu0 %vm1161_vm5, %v1145_v20 }
 0x93a   :  { %2954 = vmatprep.mubr.msk.f32.mxu0 %vm3234_vm1, %v3233_v36 }
 0xa0c   :  { %v2930_v22 = vpop.f32.mrb[10].mxu0 }
 0xa0d   :  { %v1240_v23 = vadd.f32 %v2930_v22, %v2676_v21  ;;  %v1234_v35 = vpop.f32.mrb[11].mxu0 }
 0xa0e   :  { %v1235_v33 = vadd.f32 %v2676_v21, %v1234_v35 }
 0xa0f   :  { %v1244_v24 = vadd.f32 %v1240_v23, %v1035_v47 }
 0xa10   :  { %v1243_v25 = vadd.f32 %v1235_v33, %v1034_v45  ;;  %v2684_v45 = vld [vmem:[%s3828_s26 + $0x38] sm:$0xff] }
 0xa11   :  { %v1250_v26 = vsel %vm71_vm0, %v1244_v24, 0.0  ;;  %v3089_v46 = vpack.c.bf16 %v2684_v45, %v2683_v44 }
 0xa12   :  { %1251 = vadd.xlane.f32.xlu1 %v1250_v26  ;;  %v1247_v27 = vsel %vm71_vm0, %v1243_v25, 0.0 }
 0xa13   :  { %1248 = vadd.xlane.f32.xlu0 %v1247_v27  ;;  %3090 = vmatprep.subr.bf16.mxu1 %v3089_v46 }
 0xa14   :  { %3092 = vmatpush3.bf16.msra.mxu1 %v3089_v46 }
 0xa15   :  { %2942 = vmatprep.subr.mxu1 %v3233_v36 }
 0xa9f   :  { %v1252_v28 = vpop.xlane.xlu1 %1251 }
 0xaa0   :  { %v1254_v29 = vmul.f32 0.03125, %v1252_v28  ;;  %v1249_v30 = vpop.xlane.xlu0 %1248 }
 0xaa1   :  { %v1253_v31 = vmul.f32 0.03125, %v1249_v30 }
 0xaa2   :  { %v1256_v32 = vsub.f32 %v1244_v24, %v1254_v29 }
 0xaa3   :  { %v1255_v34 = vsub.f32 %v1243_v25, %v1253_v31 }
 0xaa4   :  { %v1258_v37 = vmul.f32 %v1256_v32, %v1256_v32 }
 0xaa5   :  { %v1257_v38 = vmul.f32 %v1255_v34, %v1255_v34 }
 0xaa6   :  { %v1262_v39 = vsel %vm71_vm0, %v1258_v37, 0.0 }
 0xaa7   :  { %1263 = vadd.xlane.f32.xlu1 %v1262_v39  ;;  %v1259_v40 = vsel %vm71_vm0, %v1257_v38, 0.0 }
 0xaa8   :  { %1260 = vadd.xlane.f32.xlu0 %v1259_v40 }
 0xb34   :  { %v1264_v47 = vpop.xlane.xlu1 %1263 }
 0xb35   :  { %v1266_v48 = vmul.f32 0.03125, %v1264_v47  ;;  %v1261_v49 = vpop.xlane.xlu0 %1260 }
 0xb36   :  { %v1265_v50 = vmul.f32 0.03125, %v1261_v49 }
 0xb37   :  { %v1268_v51 = vadd.f32 1e-12, %v1266_v48 }
 0xb38   :  { %v1267_v53 = vadd.f32 1e-12, %v1265_v50 }
 0xb39   :  { %3175 = vrsqrt.f32 %v1268_v51 }
 0xb3a   :  { %3177 = vrsqrt.f32 %v1267_v53 }
 0xb43   :  { %v3176_v54 = vpop.eup %3175 }
 0xb44   :  { %v3178_v56 = vpop.eup %3177  ;;  %v1272_v57 = vmul.f32 %v3176_v54, %v1256_v32 }
 0xb45   :  { %v1271_v58 = vmul.f32 %v3178_v56, %v1255_v34 }
 0xb46   :  { %v1280_v60 = vmul.f32 %v2679_v55, %v1272_v57 }
 0xb47   :  { %v1279_v61 = vmul.f32 %v2679_v55, %v1271_v58 }
 0xb48   :  { %v3577_v63 = vadd.f32 %v2680_v59, %v1280_v60 }
 0xb49   :  { %v3575_v62 = vadd.f32 %v2680_v59, %v1279_v61 }
 0xb4b   :  { %2939 = vmatprep.mubr.msk.f32.mxu1 %vm71_vm0, %v3575_v62 }
 0xb4c   :  { %2940 = vmatmul.mubr.msk.f32.vlgmr.msra.gmra.mrb[12].mxu1 %vm71_vm0, %v3577_v63 }
 0xb4d   :  { %2944 = vmatprep.mubr.msk.f32.mxu1 %vm3234_vm1, %v3233_v36 }
 0xc1f   :  { %v2941_v2 = vpop.f32.mrb[12].mxu1 }
 0xc20   :  { %v1374_v3 = vpop.f32.mrb[13].mxu1  ;;  %v3594_v5 = vadd.f32 %v2941_v2, %v2686_v1 }
 0xc21   :  { %v3588_v4 = vadd.f32 %v2686_v1, %v1374_v3 }
 0xc23   :  { %1552 = vrot.lane.b32.xlu1 %v3588_v4, %s3235_s27  ;;  %1384 = vrot.lane.b32.xlu0 %v3588_v4, %s3236_s28 }
 0xc27   :  { %1550 = vrot.lane.b32.xlu1 %v3588_v4, %s3237_s4  ;;  %1891 = vrot.lane.b32.xlu0 %v3594_v5, %s3235_s27  ;;  %s3833_s27 = smov 16  }
 0xc2b   :  { %1723 = vrot.lane.b32.xlu1 %v3594_v5, %s3236_s28 }
 0xc2f   :  { %1889 = vrot.lane.b32.xlu1 %v3594_v5, %s3237_s4 }
 0xc95   :  { %v1553_v6 = vpop.permute.xlu1 %1552  ;;  %v1385_v7 = vpop.permute.xlu0 %1384 }
 0xc96   :  { %2943 = vmatpush3.xpose.msk.msra.mxu1 %vm210_vm2, %v1385_v7  ;;  %2953 = vmatpush3.xpose.msk.msra.mxu0 %vm210_vm2, %v1553_v6 }
 0xc97   :  { %2962 = vmatprep.subr.mxu0 %v3233_v36  ;;  %2947 = vmatprep.subr.mxu1 %v3233_v36 }
 0xc99   :  { %v1551_v8 = vpop.permute.xlu1 %1550  ;;  %2945 = vmatmul.mubr.msk.f32.vlgmr.msra.gmra.mrb[14].mxu1 %vm210_vm2, %v3588_v4  ;;  %v1892_v10 = vpop.permute.xlu0 %1891 }
 0xc9a   :  { %2955 = vmatmul.mubr.msk.f32.vlgmr.msra.gmra.mrb[12].mxu0 %vm210_vm2, %v1551_v8  ;;  %2949 = vmatprep.mubr.msk.f32.mxu1 %vm3234_vm1, %v3233_v36 }
 0xc9b   :  { %2964 = vmatprep.mubr.msk.f32.mxu0 %vm3234_vm1, %v3233_v36 }
 0xc9d   :  { %v1724_v9 = vpop.permute.xlu1 %1723 }
 0xc9e   :  { %2963 = vmatpush3.xpose.msk.msra.mxu0 %vm210_vm2, %v1724_v9 }
 0xc9f   :  { %2972 = vmatprep.subr.mxu0 %v3233_v36 }
 0xca1   :  { %2965 = vmatmul.mubr.msk.f32.vlgmr.msra.gmra.mrb[14].mxu0 %vm210_vm2, %v3594_v5  ;;  %v1890_v11 = vpop.permute.xlu1 %1889 }
 0xca2   :  { %2973 = vmatpush3.xpose.msk.msra.mxu0 %vm210_vm2, %v1892_v10  ;;  %2974 = vmatprep.mubr.msk.f32.mxu0 %vm3234_vm1, %v3233_v36 }
 0xca5   :  { %2975 = vmatmul.mubr.msk.f32.vlgmr.msra.gmra.mrb[16].mxu0 %vm210_vm2, %v1890_v11 }
 0xd6c   :  { %v1456_v12 = vpop.f32.mrb[14].mxu1 }
 0xd6d   :  { %v1460_v13 = vmul.f32 0.25, %v1456_v12  ;;  %v2946_v14 = vpop.f32.mrb[15].mxu1  ;;  %v1624_v15 = vpop.f32.mrb[12].mxu0 }
 0xd6e   :  { %v1628_v16 = vmul.f32 0.25, %v1624_v15  ;;  %v2956_v17 = vpop.f32.mrb[13].mxu0  ;;  %v2702_v14 = vld [vmem:[%s3801_s6 + $0x28] sm:$0xff] }
 0xd6f   :  { %v1461_v18 = vadd.f32 %v1460_v13, %v3431_v52  ;;  %v2701_v13 = vld [vmem:[%s3801_s6 + $0x20] sm:$0xff]  ;;  %v2704_v17 = vld [vmem:[%s3801_s6 + $0x38] sm:$0xff] }
 0xd70   :  { %v1629_v19 = vadd.f32 %v1628_v16, %v3431_v52  ;;  %v3093_v15 = vpack.c.bf16 %v2702_v14, %v2701_v13  ;;  %v2703_v16 = vld [vmem:[%s3801_s6 + $0x30] sm:$0xff]  ;;  %v2728_v13 = vld [vmem:[%s3807_s12 + $0x78] sm:$0xff] }
 0xd71   :  { %v1462_v20 = vsel %vm291_vm3, %v1461_v18, -inf }
 0xd72   :  { %1463 = vmax.xlane.f32.xlu0 %v1462_v20  ;;  %v1630_v21 = vsel %vm291_vm3, %v1629_v19, -inf  ;;  %3094 = vmatprep.subr.bf16.mxu0 %v3093_v15 }
 0xd73   :  { %1631 = vmax.xlane.f32.xlu1 %v1630_v21  ;;  %3096 = vmatpush3.bf16.msra.mxu0 %v3093_v15  ;;  %v2718_v15 = vld [vmem:[%s3806_s11 + $0x1] ss:$0 sm:$0xff] }
 0xd74   :  { %v1795_v22 = vpop.f32.mrb[14].mxu0 }
 0xd75   :  { %v1799_v23 = vmul.f32 0.25, %v1795_v22  ;;  %v2966_v35 = vpop.f32.mrb[15].mxu0 }
 0xd77   :  { %v1800_v33 = vadd.f32 %v1799_v23, %v3437_v0 }
 0xd78   :  { %v1963_v24 = vpop.f32.mrb[16].mxu0 }
 0xd79   :  { %v1967_v25 = vmul.f32 0.25, %v1963_v24  ;;  %v2976_v26 = vpop.f32.mrb[17].mxu0  ;;  %v1801_v27 = vsel %vm291_vm3, %v1800_v33, -inf }
 0xd7a   :  { %1802 = vmax.xlane.f32.xlu0 %v1801_v27 }
 0xd7b   :  { %v1968_v28 = vadd.f32 %v1967_v25, %v3437_v0 }
 0xd7d   :  { %v1969_v52 = vsel %vm291_vm3, %v1968_v28, -inf }
 0xd7e   :  { %1970 = vmax.xlane.f32.xlu0 %v1969_v52 }
 0xdff   :  { %v1464_v29 = vpop.xlane.xlu0 %1463 }
 0xe00   :  { %v1465_v30 = vsub.f32 %v1461_v18, %v1464_v29  ;;  %v1632_v31 = vpop.xlane.xlu1 %1631  ;;  %v3097_v18 = vpack.c.bf16 %v2704_v17, %v2703_v16 }
 0xe01   :  { %v1633_v32 = vsub.f32 %v1629_v19, %v1632_v31 }
 0xe02   :  { %v1466_v34 = vmul.f32 1.442695, %v1465_v30  ;;  %3098 = vmatprep.subr.bf16.mxu0 %v3097_v18 }
 0xe03   :  { %v1634_v37 = vmul.f32 1.442695, %v1633_v32  ;;  %3100 = vmatpush3.bf16.msra.mxu0 %v3097_v18 }
 0xe04   :  { %3179 = vpow2.f32 %v1466_v34 }
 0xe05   :  { %3181 = vpow2.f32 %v1634_v37 }
 0xe07   :  { %v1803_v38 = vpop.xlane.xlu0 %1802 }
 0xe08   :  { %v1804_v39 = vsub.f32 %v1800_v33, %v1803_v38  ;;  %v2706_v33 = vld [vmem:[%s3802_s7 + $0x1] ss:$0 sm:$0xff] }
 0xe0a   :  { %v1805_v40 = vmul.f32 1.442695, %v1804_v39 }
 0xe0b   :  { %v1971_v46 = vpop.xlane.xlu0 %1970 }
 0xe0c   :  { %3183 = vpow2.f32 %v1805_v40  ;;  %v1972_v47 = vsub.f32 %v1968_v28, %v1971_v46 }
 0xe0e   :  { %v3180_v42 = vpop.eup %3179  ;;  %v1973_v48 = vmul.f32 1.442695, %v1972_v47 }
 0xe0f   :  { %v3182_v41 = vpop.eup %3181  ;;  %v1468_v43 = vsel %vm291_vm3, %v3180_v42, 0.0 }
 0xe10   :  { %1469 = vadd.xlane.f32.xlu0 %v1468_v43  ;;  %v1636_v0 = vsel %vm291_vm3, %v3182_v41, 0.0  ;;  %3185 = vpow2.f32 %v1973_v48  ;;  %v2714_v43 = vld [vmem:[%s3805_s10 + $0x28] sm:$0xff] }
 0xe11   :  { %1637 = vadd.xlane.f32.xlu1 %v1636_v0 }
 0xe16   :  { %v3184_v44 = vpop.eup %3183 }
 0xe17   :  { %v1807_v45 = vsel %vm291_vm3, %v3184_v44, 0.0 }
 0xe18   :  { %1808 = vadd.xlane.f32.xlu0 %v1807_v45  ;;  %v2716_v45 = vld [vmem:[%s3805_s10 + $0x38] sm:$0xff] }
 0xe1a   :  { %v3186_v49 = vpop.eup %3185 }
 0xe1b   :  { %v1975_v50 = vsel %vm291_vm3, %v3186_v49, 0.0 }
 0xe22   :  { %1641 = vrot.lane.b32.xlu1 %v3588_v4, %s3238_s21 }
 0xe26   :  { %1812 = vrot.lane.b32.xlu1 %v3594_v5, %s3832_s5 }
 0xe2e   :  { %1473 = vrot.lane.b32.xlu0 %v3588_v4, %s3832_s5 }
 0xe4a   :  { %1976 = vadd.xlane.f32.xlu1 %v1975_v50 }
 0xe5b   :  { %1980 = vrot.lane.b32.xlu1 %v3594_v5, %s3238_s21 }
 0xe9d   :  { %v1470_v51 = vpop.xlane.xlu0 %1469 }
 0xe9e   :  { %3187 = vrcp.f32 %v1470_v51  ;;  %v1638_v53 = vpop.xlane.xlu1 %1637 }
 0xe9f   :  { %3189 = vrcp.f32 %v1638_v53 }
 0xea2   :  { %v1642_v57 = vpop.permute.xlu1 %1641 }
 0xea5   :  { %v1809_v54 = vpop.xlane.xlu0 %1808 }
 0xea6   :  { %3191 = vrcp.f32 %v1809_v54  ;;  %v1813_v61 = vpop.permute.xlu1 %1812 }
 0xea8   :  { %v3188_v55 = vpop.eup %3187 }
 0xea9   :  { %v1472_v56 = vmul.f32 %v3188_v55, %v3180_v42  ;;  %v1474_v58 = vpop.permute.xlu0 %1473  ;;  %v3190_v59 = vpop.eup %3189  ;;  %v2711_v55 = vld [vmem:[%s3803_s8 + $0x1] ss:$0 sm:$0xff] }
 0xeaa   :  { %2948 = vmatpush3.msra.mxu1 %v1474_v58  ;;  %v1640_v60 = vmul.f32 %v3190_v59, %v3182_v41 }
 0xeab   :  { %2950 = vmatmul.mubr.msk.f32.vlgmr.msra.gmra.mrb[16].mxu1 %vm291_vm3, %v1472_v56  ;;  %2957 = vmatprep.subr.mxu1 %v3233_v36 }
 0xeac   :  { %2958 = vmatpush3.msra.mxu1 %v1642_v57  ;;  %2959 = vmatprep.mubr.msk.f32.mxu1 %vm3234_vm1, %v3233_v36  ;;  %v2712_v57 = vld [vmem:[%s3804_s9 + $0x1] ss:$0 sm:$0xff] }
 0xead   :  { %2967 = vmatprep.subr.mxu1 %v3233_v36 }
 0xeaf   :  { %2960 = vmatmul.mubr.msk.f32.vlgmr.msra.gmra.mrb[18].mxu1 %vm291_vm3, %v1640_v60 }
 0xeb0   :  { %v3192_v1 = vpop.eup %3191  ;;  %2968 = vmatpush3.msra.mxu1 %v1813_v61  ;;  %2969 = vmatprep.mubr.msk.f32.mxu1 %vm3234_vm1, %v3233_v36 }
 0xeb1   :  { %v1811_v2 = vmul.f32 %v3192_v1, %v3184_v44  ;;  %2977 = vmatprep.subr.mxu1 %v3233_v36  ;;  %v2715_v44 = vld [vmem:[%s3805_s10 + $0x30] sm:$0xff] }
 0xeb2   :  { %v3105_v46 = vpack.c.bf16 %v2716_v45, %v2715_v44 }
 0xeb3   :  { %2970 = vmatmul.mubr.msk.f32.vlgmr.msra.gmra.mrb[20].mxu1 %vm291_vm3, %v1811_v2 }
 0xeb4   :  { %2979 = vmatprep.mubr.msk.f32.mxu1 %vm3234_vm1, %v3233_v36 }
 0xed7   :  { %v1977_v3 = vpop.xlane.xlu1 %1976 }
 0xed8   :  { %3193 = vrcp.f32 %v1977_v3  ;;  %v2721_v3 = vld [vmem:[%s3807_s12 + $0x40] sm:$0xff] }
 0xedb   :  { %v1981_v4 = vpop.permute.xlu1 %1980 }
 0xedc   :  { %2978 = vmatpush3.msra.mxu1 %v1981_v4  ;;  %v2722_v4 = vld [vmem:[%s3807_s12 + $0x48] sm:$0xff] }
 0xee2   :  { %v3194_v5 = vpop.eup %3193 }
 0xee3   :  { %v1979_v6 = vmul.f32 %v3194_v5, %v3186_v49  ;;  %v3109_v5 = vpack.c.bf16 %v2722_v4, %v2721_v3 }
 0xee5   :  { %2980 = vmatmul.mubr.msk.f32.vlgmr.msra.gmra.mrb[22].mxu1 %vm291_vm3, %v1979_v6  ;;  %v2723_v6 = vld [vmem:[%s3807_s12 + $0x50] sm:$0xff]  ;;  %3110 = vmatprep.subr.bf16.mxu0 %v3109_v5 }
 0xf7e   :  { %v1545_v7 = vpop.f32.mrb[16].mxu1 }
 0xf7f   :  { %1549 = vst.msk [vmem:[#allocation2] sm:$0xff] %vm210_vm2, %v1545_v7  ;;  %v2951_v8 = vpop.f32.mrb[17].mxu1  ;;  %v2724_v7 = vld [vmem:[%s3807_s12 + $0x58] sm:$0xff] }
 0xf80   :  { %v3113_v8 = vpack.c.bf16 %v2724_v7, %v2723_v6 }
 0xf82   :  { %v1713_v9 = vpop.f32.mrb[18].mxu1 }
 0xf83   :  { %1718 = vrot.lane.b32.xlu0 %v1713_v9, %s3833_s27  ;;  %v2961_v10 = vpop.f32.mrb[19].mxu1  ;;  %v2725_v9 = vld [vmem:[%s3807_s12 + $0x60] sm:$0xff] }
 0xf84   :  { %v2726_v10 = vld [vmem:[%s3807_s12 + $0x68] sm:$0xff] }
 0xf86   :  { %v1884_v11 = vpop.f32.mrb[20].mxu1 }
 0xf87   :  { %1888 = vst.msk [vmem:[#allocation2 + $0x8] sm:$0xff] %vm210_vm2, %v1884_v11  ;;  %v2971_v12 = vpop.f32.mrb[21].mxu1  ;;  %v3117_v11 = vpack.c.bf16 %v2726_v10, %v2725_v9 }
 0xf88   :  { %v2727_v12 = vld [vmem:[%s3807_s12 + $0x70] sm:$0xff] }
 0xf89   :  { %v3121_v14 = vpack.c.bf16 %v2728_v13, %v2727_v12 }
 0xfb8   :  { %v2052_v19 = vpop.f32.mrb[22].mxu1 }
 0xfb9   :  { %2057 = vrot.lane.b32.xlu1 %v2052_v19, %s3833_s27  ;;  %v2981_v20 = vpop.f32.mrb[23].mxu1 }
 0xff5   :  { %v1719_v21 = vpop.permute.xlu0 %1718 }
 0xff6   :  { %1721 = vst.msk [vmem:[#allocation2] sm:$0xff] %vm551_vm4, %v1719_v21 }
 0xffd   :  { %v2061_v22 = vld [vmem:[#allocation2] sm:$0xff] }
 0xffe   :  { %2990 = vmatprep.mubr.msk.f32.mxu0 %vm71_vm0, %v2061_v22 }
0x102b   :  { %v2058_v23 = vpop.permute.xlu1 %2057 }
0x102c   :  { %2060 = vst.msk [vmem:[#allocation2 + $0x8] sm:$0xff] %vm551_vm4, %v2058_v23 }
0x1033   :  { %v2062_v35 = vld [vmem:[#allocation2 + $0x8] sm:$0xff] }
0x1034   :  { %2991 = vmatmul.mubr.msk.f32.vlgmr.msra.gmra.mrb[18].mxu0 %vm71_vm0, %v2062_v35 }
0x1035   :  { %3112 = vmatpush3.bf16.msra.mxu0 %v3109_v5 }
0x1036   :  { %3114 = vmatprep.subr.bf16.mxu0 %v3113_v8 }
0x1039   :  { %3116 = vmatpush3.bf16.msra.mxu0 %v3113_v8  ;;  %v2735_v8 = vld [vmem:[%s3809_s14 + $0x1] ss:$0 sm:$0xff] }
0x103a   :  { %3118 = vmatprep.subr.bf16.mxu0 %v3117_v11 }
0x103d   :  { %3120 = vmatpush3.bf16.msra.mxu0 %v3117_v11  ;;  %v2736_v11 = vld [vmem:[%s3810_s15 + $0x1] ss:$0 sm:$0xff] }
0x103e   :  { %3122 = vmatprep.subr.bf16.mxu0 %v3121_v14 }
0x1041   :  { %3124 = vmatpush3.bf16.msra.mxu0 %v3121_v14 }
0x1107   :  { %v2992_v24 = vpop.f32.mrb[18].mxu0 }
0x1108   :  { %v2154_v25 = vadd.f32 %v2992_v24, %v2706_v33  ;;  %v2148_v26 = vpop.f32.mrb[19].mxu0 }
0x1109   :  { %v2149_v27 = vadd.f32 %v2706_v33, %v2148_v26 }
0x110a   :  { %v2158_v28 = vadd.f32 %v2154_v25, %v3577_v63 }
0x110b   :  { %v2157_v52 = vadd.f32 %v2149_v27, %v3575_v62  ;;  %v2713_v62 = vld [vmem:[%s3805_s10 + $0x20] sm:$0xff] }
0x110c   :  { %v2166_v29 = vsel %vm71_vm0, %v2158_v28, 0.0  ;;  %v3101_v0 = vpack.c.bf16 %v2714_v43, %v2713_v62 }
0x110d   :  { %2167 = vadd.xlane.f32.xlu1 %v2166_v29  ;;  %v2163_v30 = vsel %vm71_vm0, %v2157_v52, 0.0 }
0x110e   :  { %2164 = vadd.xlane.f32.xlu0 %v2163_v30  ;;  %3102 = vmatprep.subr.bf16.mxu1 %v3101_v0 }
0x110f   :  { %3104 = vmatpush3.bf16.msra.mxu1 %v3101_v0 }
0x1110   :  { %3106 = vmatprep.subr.bf16.mxu1 %v3105_v46 }
0x1113   :  { %3108 = vmatpush3.bf16.msra.mxu1 %v3105_v46 }
0x119a   :  { %v2168_v31 = vpop.xlane.xlu1 %2167 }
0x119b   :  { %v2170_v32 = vmul.f32 0.03125, %v2168_v31  ;;  %v2165_v34 = vpop.xlane.xlu0 %2164 }
0x119c   :  { %v2169_v37 = vmul.f32 0.03125, %v2165_v34 }
0x119d   :  { %v2172_v38 = vsub.f32 %v2158_v28, %v2170_v32 }
0x119e   :  { %v2171_v39 = vsub.f32 %v2157_v52, %v2169_v37 }
0x119f   :  { %v2174_v41 = vmul.f32 %v2172_v38, %v2172_v38 }
0x11a0   :  { %v2173_v40 = vmul.f32 %v2171_v39, %v2171_v39 }
0x11a1   :  { %v2178_v63 = vsel %vm71_vm0, %v2174_v41, 0.0 }
0x11a2   :  { %v2175_v42 = vsel %vm71_vm0, %v2173_v40, 0.0 }
0x11a3   :  { %2176 = vadd.xlane.f32.xlu0 %v2175_v42 }
0x11a7   :  { %2179 = vadd.xlane.f32.xlu0 %v2178_v63 }
0x1230   :  { %v2177_v47 = vpop.xlane.xlu0 %2176 }
0x1231   :  { %v2181_v48 = vmul.f32 0.03125, %v2177_v47 }
0x1233   :  { %v2183_v49 = vadd.f32 1e-12, %v2181_v48 }
0x1234   :  { %v2180_v50 = vpop.xlane.xlu0 %2179 }
0x1235   :  { %3195 = vrsqrt.f32 %v2183_v49  ;;  %v2182_v51 = vmul.f32 0.03125, %v2180_v50 }
0x1237   :  { %v2184_v53 = vadd.f32 1e-12, %v2182_v51 }
0x1239   :  { %3197 = vrsqrt.f32 %v2184_v53 }
0x123f   :  { %v3196_v54 = vpop.eup %3195 }
0x1240   :  { %v2187_v56 = vmul.f32 %v3196_v54, %v2171_v39 }
0x1242   :  { %v2195_v58 = vmul.f32 %v2711_v55, %v2187_v56  ;;  %v2468_v56 = vld [vmem:[%s3811_s16 + $0x8] sm:$0xff] }
0x1243   :  { %v3198_v59 = vpop.eup %3197 }
0x1244   :  { %v2188_v60 = vmul.f32 %v3198_v59, %v2172_v38  ;;  %v2203_v61 = vadd.f32 %v2712_v57, %v2195_v58  ;;  %v2730_v38 = vld [vmem:[%s3808_s13 + $0x1] ss:$0 sm:$0xff]  ;;  %v2469_v58 = vld [vmem:[%s3811_s16 + $0x10] sm:$0xff]  ;;  %v2470_v59 = vld [vmem:[%s3811_s16 + $0x18] sm:$0xff] }
0x1246   :  { %v2196_v1 = vmul.f32 %v2711_v55, %v2188_v60  ;;  %3001 = vmatprep.mubr.msk.f32.mxu1 %vm71_vm0, %v2203_v61  ;;  %v2467_v55 = vld [vmem:[%s3811_s16] sm:$0xff]  ;;  %v3241_v60 = vmov 0.0|0.0  }
0x1247   :  { %3125 = vmatprep.subr.bf16.mxu1 %v3241_v60 }
0x1248   :  { %v2204_v2 = vadd.f32 %v2712_v57, %v2196_v1  ;;  %v3126_v57 = vpack.c.bf16 %v2468_v56, %v2467_v55 }
0x124a   :  { %3002 = vmatmul.mubr.msk.f32.vlgmr.msra.gmra.mrb[24].mxu1 %vm71_vm0, %v2204_v2 }
0x124b   :  { %3031 = vmatprep.mubr.msk.f32.mxu1 %vm3234_vm1, %v3233_v36  ;;  %3127 = vmatpush3.bf16.msra.mxu1 %v3126_v57 }
0x124c   :  { %3128 = vmatprep.subr.bf16.mxu1 %v3241_v60 }
0x131d   :  { %v3003_v16 = vpop.f32.mrb[24].mxu1 }
0x131e   :  { %v2296_v17 = vadd.f32 %v3003_v16, %v2718_v15  ;;  %v2290_v18 = vpop.f32.mrb[25].mxu1 }
0x131f   :  { %v2291_v19 = vadd.f32 %v2718_v15, %v2290_v18  ;;  %v2552_v18 = vld [vmem:[%s3813_s18] sm:$0xff] }
0x1320   :  { %v2302_v20 = vmul.f32 0.044715, %v2296_v17  ;;  %v2300_v32 = vmul.f32 0.5, %v2296_v17 }
0x1321   :  { %v2301_v21 = vmul.f32 0.044715, %v2291_v19  ;;  %v2299_v30 = vmul.f32 0.5, %v2291_v19 }
0x1322   :  { %v2304_v22 = vmul.f32 %v2302_v20, %v2296_v17  ;;  %v2554_v20 = vld [vmem:[%s3813_s18 + $0x10] sm:$0xff] }
0x1323   :  { %v2303_v23 = vmul.f32 %v2301_v21, %v2291_v19 }
0x1324   :  { %v2306_v35 = vmul.f32 %v2304_v22, %v2296_v17  ;;  %v2555_v22 = vld [vmem:[%s3813_s18 + $0x18] sm:$0xff] }
0x1325   :  { %v2305_v33 = vmul.f32 %v2303_v23, %v2291_v19  ;;  %v3135_v23 = vpack.c.bf16 %v2555_v22, %v2554_v20 }
0x1326   :  { %v2308_v24 = vadd.f32 %v2306_v35, %v2296_v17 }
0x1327   :  { %v2307_v25 = vadd.f32 %v2305_v33, %v2291_v19  ;;  %v2553_v19 = vld [vmem:[%s3813_s18 + $0x8] sm:$0xff]  ;;  %s3242_s18 = smov [#allocation4]  }
0x1328   :  { %v2310_v26 = vmul.f32 0.7978846, %v2308_v24  ;;  %v3132_v21 = vpack.c.bf16 %v2553_v19, %v2552_v18  ;;  %s2643_s28 = sshll.u32 %s3242_s18, 4  ;;  %s2644_s28 = int_to_ptr.vmem [resolvable:$true] %s2643_s28 }
0x1329   :  { %v2309_v27 = vmul.f32 0.7978846, %v2307_v25  ;;  %s3209_s11 = scalar_lea.vmem %s2644_s28, 32  ;;  %p3214_p1 = scmp.lt.s32.totalorder %s2644_s28, %s2644_s28 }
0x132a   :  { %3199 = vtanh.f32 %v2310_v26  ;;  %v2739_v26 = vld [vmem:[%s3814_s19] ss:$0 sm:$0xff]  ;;  %p3210_p0 = scmp.ne.s32.totalorder %s2644_s28, %s3209_s11  ;;  %p3215_p2 = scmp.lt.s32.totalorder %s3209_s11, %s3209_s11 }
0x132b   :  { %3201 = vtanh.f32 %v2309_v27 }
0x132c   :  { %p3216_p3 = por %p3215_p2, %p3214_p1 }
0x132e   :  { %p3217_p4 = pnand %p3216_p3, %p3210_p0 }
0x1334   :  { %v3200_v28 = vpop.eup %3199 }
0x1335   :  { %v3202_v52 = vpop.eup %3201  ;;  %v2314_v29 = vadd.f32 1.0, %v3200_v28 }
0x1336   :  { %v2313_v31 = vadd.f32 1.0, %v3202_v52 }
0x1337   :  { %v2316_v37 = vmul.f32 %v2314_v29, %v2300_v32 }
0x1338   :  { %v2315_v34 = vmul.f32 %v2313_v31, %v2299_v30 }
0x133a   :  { %3020 = vmatprep.mubr.msk.f32.mxu0 %vm1161_vm5, %v2315_v34 }
0x133b   :  { %3021 = vmatmul.mubr.msk.f32.vlgmr.msra.gmra.mrb[20].mxu0 %vm1161_vm5, %v2316_v37 }
0x140e   :  { %v3022_v39 = vpop.f32.mrb[20].mxu0 }
0x140f   :  { %v2412_v40 = vadd.f32 %v3022_v39, %v2730_v38  ;;  %v2406_v42 = vpop.f32.mrb[21].mxu0 }
0x1410   :  { %v2407_v41 = vadd.f32 %v2730_v38, %v2406_v42 }
0x1411   :  { %v2416_v63 = vadd.f32 %v2412_v40, %v2204_v2 }
0x1412   :  { %v2415_v62 = vadd.f32 %v2407_v41, %v2203_v61  ;;  %v3129_v61 = vpack.c.bf16 %v2470_v59, %v2469_v58 }
0x1413   :  { %v2424_v43 = vsel %vm71_vm0, %v2416_v63, 0.0 }
0x1414   :  { %2425 = vadd.xlane.f32.xlu1 %v2424_v43  ;;  %v2421_v0 = vsel %vm71_vm0, %v2415_v62, 0.0  ;;  %3130 = vmatpush3.bf16.msra.mxu1 %v3129_v61 }
0x1415   :  { %2422 = vadd.xlane.f32.xlu0 %v2421_v0  ;;  %3131 = vmatprep.subr.bf16.mxu1 %v3241_v60 }
0x14a1   :  { %v2426_v44 = vpop.xlane.xlu1 %2425 }
0x14a2   :  { %v2428_v45 = vmul.f32 0.03125, %v2426_v44  ;;  %v2423_v46 = vpop.xlane.xlu0 %2422 }
0x14a3   :  { %v2427_v47 = vmul.f32 0.03125, %v2423_v46 }
0x14a4   :  { %v2430_v48 = vsub.f32 %v2416_v63, %v2428_v45 }
0x14a5   :  { %v2429_v49 = vsub.f32 %v2415_v62, %v2427_v47 }
0x14a6   :  { %v2432_v50 = vmul.f32 %v2430_v48, %v2430_v48 }
0x14a7   :  { %v2431_v51 = vmul.f32 %v2429_v49, %v2429_v49 }
0x14a8   :  { %v2436_v53 = vsel %vm71_vm0, %v2432_v50, 0.0 }
0x14a9   :  { %2437 = vadd.xlane.f32.xlu1 %v2436_v53  ;;  %v2433_v54 = vsel %vm71_vm0, %v2431_v51, 0.0 }
0x14aa   :  { %2434 = vadd.xlane.f32.xlu0 %v2433_v54 }
0x1536   :  { %v2438_v1 = vpop.xlane.xlu1 %2437 }
0x1537   :  { %v2440_v2 = vmul.f32 0.03125, %v2438_v1  ;;  %v2435_v3 = vpop.xlane.xlu0 %2434 }
0x1538   :  { %v2439_v4 = vmul.f32 0.03125, %v2435_v3 }
0x1539   :  { %v2442_v5 = vadd.f32 1e-12, %v2440_v2 }
0x153a   :  { %v2441_v6 = vadd.f32 1e-12, %v2439_v4 }
0x153b   :  { %3203 = vrsqrt.f32 %v2442_v5 }
0x153c   :  { %3205 = vrsqrt.f32 %v2441_v6 }
0x1545   :  { %v3204_v7 = vpop.eup %3203 }
0x1546   :  { %v3206_v9 = vpop.eup %3205  ;;  %v2446_v10 = vmul.f32 %v3204_v7, %v2430_v48 }
0x1547   :  { %v2445_v12 = vmul.f32 %v3206_v9, %v2429_v49 }
0x1548   :  { %v2454_v13 = vmul.f32 %v2735_v8, %v2446_v10 }
0x1549   :  { %v2453_v14 = vmul.f32 %v2735_v8, %v2445_v12 }
0x154a   :  { %v2462_v15 = vadd.f32 %v2736_v11, %v2454_v13 }
0x154b   :  { %v2461_v16 = vadd.f32 %v2736_v11, %v2453_v14 }
0x154c   :  { %2465 = vst.msk [vmem:[#allocation3 + $0x1] sm:$0x1] %vm2463_vm6, %v2462_v15 }
0x154d   :  { %2464 = vst.msk [vmem:[#allocation3] sm:$0x1] %vm2463_vm6, %v2461_v16 }
0x1554   :  { %v2466_v17 = vld [vmem:[#allocation3] sm:$0x3] }
0x1555   :  { %3032 = vmatmul.mubr.msk.f32.vlgmr.msra.gmra.mrb[26].mxu1 %vm71_vm0, %v2466_v17 }
0x1556   :  { %3042 = vmatprep.mubr.msk.f32.mxu1 %vm3234_vm1, %v3233_v36  ;;  %3133 = vmatpush3.bf16.msra.mxu1 %v3132_v21  ;;  %v2737_v36 = vld [vmem:[%s3812_s17] ss:$0 sm:$0xff] }
0x1557   :  { %3134 = vmatprep.subr.bf16.mxu1 %v3241_v60 }
0x155a   :  { %3136 = vmatpush3.bf16.msra.mxu1 %v3135_v23 }
0x1628   :  { %v2547_v35 = vpop.f32.mrb[26].mxu1 }
0x1629   :  { %v2548_v33 = vadd.f32 %v2737_v36, %v2547_v35  ;;  %v3033_v24 = vpop.f32.mrb[27].mxu1 }
0x162b   :  { %3207 = vtanh.f32 %v2548_v33 }
0x1635   :  { %v3208_v25 = vpop.eup %3207 }
0x1636   :  { %3043 = vmatmul.mubr.msk.f32.vlgmr.msra.gmra.mrb[28].mxu1 %vm71_vm0, %v3208_v25 }
0x1709   :  { %v2632_v27 = vpop.f32.mrb[28].mxu1 }
0x170a   :  { %v2633_v28 = vadd.f32 %v2739_v26, %v2632_v27  ;;  %v3044_v52 = vpop.f32.mrb[29].mxu1 }
0x170c   :  { %2636 = vst [vmem:[#allocation4] sm:$0x3] %v2633_v28 }
0x170d   :  { %3220 = shalt.err (!%p3217_p4)
}
0x170e   :  { %s3221_s13 = scalar_lea.hbm %s3815_s20, 32 }
0x170f   :  { %p3222_p5 = scmp.ne.s32.totalorder %s3815_s20, %s3221_s13  ;;  %p3225_p6 = scmp.lt.u32.totalorder %s3221_s13, %s3815_s20 }
0x1711   :  { %p3227_p7 = pnand %p3225_p6, %p3222_p5 }
0x1713   :  { %3230 = shalt.err (!%p3227_p7)
}
0x1714   :  { %2646 = dma.vmem_to_hbm [thread:$0]  %s2644_s28, 32, %s3815_s20, [#allocation5]  }
0x1715   :  { %3231 = dma.done.wait [#allocation5], 32  }
0x1716   :  { %3232 = vsyncadd [#allocation5], 4294967264 }
0x1717   :  { %2650 = vsyncpa [#allocation5], 1 }

</bundles_post_ra>
